<compile_context>
chip_gen: v5e
topology: v5e:2x2
jax: 0.10.0
libtpu: 0.0.40
codegen_flags: <defaults>
</compile_context>

<pallas_src>
import jax
import jax.numpy as jnp
from jax.experimental import pallas as pl
from jax.experimental.pallas import tpu as pltpu


def _round_up(x, m):
    return ((x + m - 1) // m) * m


def _vmem_capacity_bytes():
    try:
        return int(pltpu.get_tpu_info().vmem_capacity_bytes)
    except Exception:
        return 128 << 20   # v5e/v6e-class fallback


def _choose_time_tile(L, cin_p0, cout_ps, kernel_size, vmem_cap):
    """Largest time tile (multiple of 16) whose working set fits ~40% of VMEM."""
    budget = int(0.40 * vmem_cap)
    # Bytes per time row: double-buffered bf16 input + bf16 outputs, plus in-kernel
    # temporaries (window/xcat bf16, conv/GLU f32 accumulators) per layer.
    per_row = 2 * 2 * cin_p0 + sum(2 * 2 * cp for cp in cout_ps)
    per_row += sum((kernel_size + 2) * 2 * cp + 6 * 4 * cp for cp in cout_ps)
    tl = (budget // max(per_row, 1)) // 16 * 16
    tl = max(16, min(tl, 2048))          # beyond ~2K rows the per-step overhead is amortized
    tl = min(tl, _round_up(L, 16))
    return int(tl)


# ----------------------------------------------------------------------------
# Fused TCN kernel: all TemporalBlocks for one (batch, time-tile) grid point.
# ----------------------------------------------------------------------------
def _make_fused_tcn_kernel(layer_meta, *, kernel_size, TL, n_layers):
    def kernel(*refs):
        x_ref = refs[0]
        pos = 1
        layer_wrefs = []
        for m in layer_meta:
            n = 4 if m["has_downsample"] else 3
            layer_wrefs.append(refs[pos:pos + n])
            pos += n
        out_refs = refs[pos:pos + n_layers]
        carry_refs = refs[pos + n_layers:pos + 2 * n_layers]

        # First time tile of this sequence: zero the causal-history carries
        # (== the causal left zero-padding of every layer's input).
        @pl.when(pl.program_id(1) == 0)
        def _():
            for cr in carry_refs:
                cr[...] = jnp.zeros_like(cr)

        cur = x_ref[0]                                        # (TL, Cin0_p) bf16
        for i, m in enumerate(layer_meta):
            d, pad = m["dilation"], m["pad"]
            rp, coutp = m["carry_rows"], m["coutp"]
            wr = layer_wrefs[i]
            w1 = wr[0][...]                                   # (k*Cin_p, Nout)    bf16
            wg = wr[1][...]                                   # (Cout_p, 2*Cout_p) bf16
            bg = wr[2][...]                                   # (1, 2*Cout_p)      f32

            # This layer's input stream over times [t0 - rp, t0 + TL).
            window = jnp.concatenate([carry_refs[i][...], cur], axis=0)   # (rp+TL, Cin_p)
            # History for the next time tile: times [t0 + TL - rp, t0 + TL).
            carry_refs[i][...] = window[TL:TL + rp, :]

            # im2col over the k dilated taps -> one MXU matmul with K = k*Cin_p.
            # Tap j of output time t reads input time t - pad + j*d; the last tap is
            # exactly `cur`, which is where the fused downsample columns live.
            xcat = jnp.concatenate(
                [window[rp - pad + j * d: rp - pad + j * d + TL, :]
                 for j in range(kernel_size)], axis=-1)                    # (TL, k*Cin_p)

            yfull = jnp.dot(xcat, w1, preferred_element_type=jnp.float32)  # (TL, Nout) f32

            # Fused GLU: one matmul -> [value | gate]; conv bias pre-folded into bg.
            ag = jnp.dot(yfull[:, :coutp].astype(jnp.bfloat16), wg,
                         preferred_element_type=jnp.float32) + bg          # (TL, 2*Cout_p)
            glu = ag[:, :coutp] * jax.nn.sigmoid(ag[:, coutp:])            # f32 elementwise

            # Residual branch (dropout is identity at inference).
            if m["has_downsample"]:
                bd = wr[3][...]                                            # (1, Cout_p) f32
                res = yfull[:, coutp:] + bd
            else:
                res = cur.astype(jnp.float32)

            cur = (glu + res).astype(jnp.bfloat16)            # bf16 inter-layer activation
            out_refs[i][0] = cur                              # bf16 hidden-state writeback

    return kernel


# ----------------------------------------------------------------------------
# TemporalConvNet forward (PyTorch-compatible NCL in / NCL out + hidden states).
# ----------------------------------------------------------------------------
def temporal_conv_net_pallas(x_ncl, params, kernel_size, *, time_tile=None,
                             channels_last=False):
    B, C0, L = (int(s) for s in x_ncl.shape)
    n_layers = len(params)
    channels = [C0] + [int(p["w1"].shape[2]) for p in params]
    cin_ps = [_round_up(c, 128) for c in channels[:-1]]      # per-layer padded in-lanes
    cout_ps = [_round_up(c, 128) for c in channels[1:]]      # per-layer padded out-lanes
    dilations = [int(p["dilation"]) for p in params]
    pads = [(kernel_size - 1) * d for d in dilations]
    carry_rows = [_round_up(max(p, 1), 16) for p in pads]    # bf16-sublane friendly history

    vmem_cap = _vmem_capacity_bytes()
    TL = time_tile if time_tile is not None else _choose_time_tile(
        L, cin_ps[0], cout_ps, kernel_size, vmem_cap)
    assert TL % 16 == 0 and TL >= 16
    Lpad = _round_up(L, TL)
    n_t = Lpad // TL

    # Channels-last bf16 input; zero right-pad on time, zero lane-pad on channels.
    x_blc = jnp.transpose(x_ncl, (0, 2, 1)).astype(jnp.bfloat16)
    xpad = jnp.pad(x_blc, ((0, 0), (0, Lpad - L), (0, cin_ps[0] - C0)))

    const = lambda b, t: (0, 0)
    in_specs = [pl.BlockSpec((1, TL, cin_ps[0]), lambda b, t: (b, t, 0))]
    flat_w = []
    layer_meta = []
    for i, p in enumerate(params):
        cin, cout = channels[i], channels[i + 1]
        cinp, coutp = cin_ps[i], cout_ps[i]
        has_ds = bool(p["has_downsample"])
        n_out_cols = 2 * coutp if has_ds else coutp

        # im2col-packed conv weight; the residual 1x1 (downsample) is fused as a
        # second N-half, living on the last tap (whose input slice == this tile).
        w1 = jnp.zeros((kernel_size, cinp, n_out_cols), jnp.float32)
        w1 = w1.at[:, :cin, :cout].set(p["w1"])
        if has_ds:
            w1 = w1.at[kernel_size - 1, :cin, coutp:coutp + cout].set(p["wd"])
        w1 = w1.reshape(kernel_size * cinp, n_out_cols).astype(jnp.bfloat16)

        # Fused GLU weight [value | gate]; conv bias folded into the GLU bias.
        wg = jnp.zeros((coutp, 2 * coutp), jnp.float32)
        wg = wg.at[:cout, :cout].set(p["wg1"]).at[:cout, coutp:coutp + cout].set(p["wg2"])
        bg = jnp.zeros((1, 2 * coutp), jnp.float32)
        bg = bg.at[:, :cout].set(p["bg1"]).at[:, coutp:coutp + cout].set(p["bg2"])
        b1 = jnp.zeros((1, coutp), jnp.float32).at[:, :cout].set(p["b1"])
        bg = bg + b1 @ wg                       # (y + b1) @ wg == y @ wg + b1 @ wg
        wg = wg.astype(jnp.bfloat16)

        flat_w += [w1, wg, bg]
        in_specs += [pl.BlockSpec(w1.shape, const),
                     pl.BlockSpec(wg.shape, const),
                     pl.BlockSpec(bg.shape, const)]
        if has_ds:
            bd = jnp.zeros((1, coutp), jnp.float32).at[:, :cout].set(p["bd"])
            flat_w.append(bd)
            in_specs.append(pl.BlockSpec(bd.shape, const))
        layer_meta.append(dict(dilation=dilations[i], pad=pads[i],
                               carry_rows=carry_rows[i], coutp=coutp,
                               has_downsample=has_ds))

    out_shape = tuple(jax.ShapeDtypeStruct((B, Lpad, cp), jnp.bfloat16) for cp in cout_ps)
    out_specs = tuple(pl.BlockSpec((1, TL, cp), lambda b, t: (b, t, 0)) for cp in cout_ps)
    scratch_shapes = [pltpu.VMEM((carry_rows[i], cin_ps[i]), jnp.bfloat16)
                      for i in range(n_layers)]

    kernel = _make_fused_tcn_kernel(layer_meta, kernel_size=kernel_size, TL=TL,
                                    n_layers=n_layers)

    # Explicit VMEM budget, capped below physical capacity (v7x has only 64 MiB/TC).
    weight_bytes = sum(int(w.size) * w.dtype.itemsize for w in flat_w)
    carry_bytes = sum(carry_rows[i] * cin_ps[i] * 2 for i in range(n_layers))
    temp_bytes = sum((kernel_size + 2) * TL * cin_ps[i] * 2 + 6 * TL * cout_ps[i] * 4
                     for i in range(n_layers))
    vmem_est = (2 * TL * cin_ps[0] * 2                       # bf16 input block, double-buffered
                + sum(2 * TL * cp * 2 for cp in cout_ps)     # bf16 output blocks, double-buffered
                + 2 * weight_bytes + carry_bytes + temp_bytes
                + (4 << 20))                                 # slack
    vmem_limit = int(min(int(0.75 * vmem_cap), max(vmem_est, 16 << 20)))

    outs = pl.pallas_call(
        kernel,
        out_shape=out_shape,
        grid=(B, n_t),
        in_specs=in_specs,
        out_specs=out_specs,
        scratch_shapes=scratch_shapes,
        compiler_params=pltpu.CompilerParams(
            # B is "parallel" (both v7x TensorCores busy when B >= 2); the time axis
            # carries per-layer causal history, so it must be "arbitrary".
            dimension_semantics=("parallel", "arbitrary"),
            vmem_limit_bytes=vmem_limit),
    )(xpad, *flat_w)

    if channels_last:
        # Fast path: bf16 NLC hidden states, no extra HBM transpose round-trips.
        hidden = [o[:, :L, :channels[i + 1]] for i, o in enumerate(outs)]
    else:
        # PyTorch-compatible NCL fp32 hidden states.
        hidden = [jnp.transpose(o[:, :L, :channels[i + 1]], (0, 2, 1)).astype(jnp.float32)
                  for i, o in enumerate(outs)]
    return hidden[-1], hidden


# ----------------------------------------------------------------------------
# Deterministic synthetic parameter init (shapes follow the PyTorch module).
# conv1 / downsample weights ~ N(0, 0.01) as in TemporalBlock.init_weights().
# ----------------------------------------------------------------------------
def init_params(key, num_inputs, num_channels, kernel_size):
    params = []
    in_ch = num_inputs
    for i, out_ch in enumerate(num_channels):
        key, *ks = jax.random.split(key, 9)
        p = dict(
            w1=0.01 * jax.random.normal(ks[0], (kernel_size, in_ch, out_ch), jnp.float32),
            b1=0.01 * jax.random.normal(ks[1], (1, out_ch), jnp.float32),
            wg1=0.10 * jax.random.normal(ks[2], (out_ch, out_ch), jnp.float32),
            bg1=0.10 * jax.random.normal(ks[3], (1, out_ch), jnp.float32),
            wg2=0.10 * jax.random.normal(ks[4], (out_ch, out_ch), jnp.float32),
            bg2=0.10 * jax.random.normal(ks[5], (1, out_ch), jnp.float32),
            dilation=2 ** i,
            has_downsample=(in_ch != out_ch),
        )
        if p["has_downsample"]:
            p["wd"] = 0.01 * jax.random.normal(ks[6], (in_ch, out_ch), jnp.float32)
            p["bd"] = 0.01 * jax.random.normal(ks[7], (1, out_ch), jnp.float32)
        params.append(p)
        in_ch = out_ch
    return params


# ----------------------------------------------------------------------------
# Pure-JAX reference (matches PyTorch Conv1d cross-correlation semantics).
# ----------------------------------------------------------------------------
def temporal_block_ref(x_ncl, p, kernel_size):
    d = int(p["dilation"])
    pad = (kernel_size - 1) * d
    w_oik = jnp.transpose(p["w1"], (2, 1, 0))        # (Cout, Cin, k) == torch layout
    y = jax.lax.conv_general_dilated(
        x_ncl, w_oik, window_strides=(1,), padding=[(pad, pad)],
        rhs_dilation=(d,), dimension_numbers=("NCH", "OIH", "NCH"))
    y = y + p["b1"][0][None, :, None]
    if pad > 0:
        y = y[:, :, :-pad]
    a = jnp.einsum("bcl,co->bol", y, p["wg1"]) + p["bg1"][0][None, :, None]
    g = jax.nn.sigmoid(jnp.einsum("bcl,co->bol", y, p["wg2"]) + p["bg2"][0][None, :, None])
    out = a * g
    if p["has_downsample"]:
        res = jnp.einsum("bcl,co->bol", x_ncl, p["wd"]) + p["bd"][0][None, :, None]
    else:
        res = x_ncl
    return out + res


def temporal_conv_net_ref(x_ncl, params, kernel_size):
    out = x_ncl
    hidden = []
    for p in params:
        out = temporal_block_ref(out, p, kernel_size)
        hidden.append(out)
    return out, hidden


if __name__ == "__main__":
    key = jax.random.PRNGKey(0)
    B, num_inputs, L = 2, 4, 48
    num_channels = (8, 8)            # two TemporalBlocks: dilation 1, 2
    kernel_size = 3

    k_x, k_p = jax.random.split(key)
    x = jax.random.normal(k_x, (B, num_inputs, L), jnp.float32)   # NCL like PyTorch
    params = init_params(k_p, num_inputs, num_channels, kernel_size)

    # time_tile=16 forces 3 time tiles so the cross-tile causal carry is exercised.
    out, hidden_states = temporal_conv_net_pallas(x, params, kernel_size, time_tile=16)
    out = jax.block_until_ready(out)
    hidden_states = [jax.block_until_ready(h) for h in hidden_states]

    # Verify against the pure-JAX / PyTorch-semantics reference.
    out_ref, hidden_ref = temporal_conv_net_ref(x, params, kernel_size)
    assert out.shape == (B, num_channels[-1], L)
    assert len(hidden_states) == len(num_channels)
    # bf16 MXU inputs / bf16 hidden-state storage (f32 accumulation) -> loosened tolerances.
    assert jnp.allclose(out, out_ref, rtol=5e-2, atol=7.5e-3)
    for h, hr in zip(hidden_states, hidden_ref):
        assert jnp.allclose(h, hr, rtol=5e-2, atol=7.5e-3)

    print("KERNEL_OK")
</pallas_src>

<mosaic_0001>
module attributes {stable_mosaic.version = 11 : i64} {
  func.func @kernel(%arg0: i32, %arg1: i32, %arg2: memref<1x16x128xbf16, #tpu.memory_space<vmem>>, %arg3: memref<384x256xbf16, #tpu.memory_space<vmem>>, %arg4: memref<128x256xbf16, #tpu.memory_space<vmem>>, %arg5: memref<1x256xf32, #tpu.memory_space<vmem>>, %arg6: memref<1x128xf32, #tpu.memory_space<vmem>>, %arg7: memref<384x128xbf16, #tpu.memory_space<vmem>>, %arg8: memref<128x256xbf16, #tpu.memory_space<vmem>>, %arg9: memref<1x256xf32, #tpu.memory_space<vmem>>, %arg10: memref<1x16x128xbf16, #tpu.memory_space<vmem>>, %arg11: memref<1x16x128xbf16, #tpu.memory_space<vmem>>, %arg12: memref<16x128xbf16, #tpu.memory_space<vmem>>, %arg13: memref<16x128xbf16, #tpu.memory_space<vmem>>) attributes {dimension_semantics = [#tpu.dimension_semantics<parallel>, #tpu.dimension_semantics<arbitrary>], iteration_bounds = array<i64: 2, 3>, scalar_prefetch = 0 : i64, scratch_operands = 2 : i64, tpu.core_type = #tpu.core_type<tc>, window_params = [{transform_indices = @transform_0, window_bounds = array<i64: 1, 16, 128>}, {pipeline_mode = #tpu.pipeline_mode<synchronous>, transform_indices = @transform_1, window_bounds = array<i64: 384, 256>}, {pipeline_mode = #tpu.pipeline_mode<synchronous>, transform_indices = @transform_2, window_bounds = array<i64: 128, 256>}, {pipeline_mode = #tpu.pipeline_mode<synchronous>, transform_indices = @transform_3, window_bounds = array<i64: 1, 256>}, {pipeline_mode = #tpu.pipeline_mode<synchronous>, transform_indices = @transform_4, window_bounds = array<i64: 1, 128>}, {pipeline_mode = #tpu.pipeline_mode<synchronous>, transform_indices = @transform_5, window_bounds = array<i64: 384, 128>}, {pipeline_mode = #tpu.pipeline_mode<synchronous>, transform_indices = @transform_6, window_bounds = array<i64: 128, 256>}, {pipeline_mode = #tpu.pipeline_mode<synchronous>, transform_indices = @transform_7, window_bounds = array<i64: 1, 256>}, {transform_indices = @transform_8, window_bounds = array<i64: 1, 16, 128>}, {transform_indices = @transform_9, window_bounds = array<i64: 1, 16, 128>}]} {
    %c0_i32 = arith.constant 0 : i32
    %0 = arith.cmpi eq, %arg1, %c0_i32 : i32
    %1 = arith.extui %0 : i1 to i32
    %c0_i32_0 = arith.constant 0 : i32
    %2 = arith.cmpi ne, %1, %c0_i32_0 : i32
    scf.if %2 {
      %cst_36 = arith.constant 0.000000e+00 : bf16
      %69 = vector.broadcast %cst_36 : bf16 to vector<16x128xbf16>
      %c0_37 = arith.constant 0 : index
      %c0_38 = arith.constant 0 : index
      %70 = vector.load %arg12[%c0_37, %c0_38] : memref<16x128xbf16, #tpu.memory_space<vmem>>, vector<16x128xbf16>
      tpu.vector_store %arg12[%c0_37, %c0_38], %69 {strides = array<i32>} : memref<16x128xbf16, #tpu.memory_space<vmem>>, vector<16x128xbf16>,
      %cst_39 = arith.constant 0.000000e+00 : bf16
      %71 = vector.broadcast %cst_39 : bf16 to vector<16x128xbf16>
      %c0_40 = arith.constant 0 : index
      %c0_41 = arith.constant 0 : index
      %72 = vector.load %arg13[%c0_40, %c0_41] : memref<16x128xbf16, #tpu.memory_space<vmem>>, vector<16x128xbf16>
      tpu.vector_store %arg13[%c0_40, %c0_41], %71 {strides = array<i32>} : memref<16x128xbf16, #tpu.memory_space<vmem>>, vector<16x128xbf16>,
    } else {
    }
    %c0 = arith.constant 0 : index
    %c0_1 = arith.constant 0 : index
    %c0_2 = arith.constant 0 : index
    %3 = vector.load %arg2[%c0, %c0_1, %c0_2] : memref<1x16x128xbf16, #tpu.memory_space<vmem>>, vector<1x16x128xbf16>
    %4 = vector.shape_cast %3 : vector<1x16x128xbf16> to vector<16x128xbf16>
    %c0_3 = arith.constant 0 : index
    %c0_4 = arith.constant 0 : index
    %5 = vector.load %arg3[%c0_3, %c0_4] : memref<384x256xbf16, #tpu.memory_space<vmem>>, vector<384x256xbf16>
    %c0_5 = arith.constant 0 : index
    %c0_6 = arith.constant 0 : index
    %6 = vector.load %arg4[%c0_5, %c0_6] : memref<128x256xbf16, #tpu.memory_space<vmem>>, vector<128x256xbf16>
    %c0_7 = arith.constant 0 : index
    %c0_8 = arith.constant 0 : index
    %7 = vector.load %arg5[%c0_7, %c0_8] : memref<1x256xf32, #tpu.memory_space<vmem>>, vector<1x256xf32>
    %c0_9 = arith.constant 0 : index
    %c0_10 = arith.constant 0 : index
    %8 = vector.load %arg12[%c0_9, %c0_10] : memref<16x128xbf16, #tpu.memory_space<vmem>>, vector<16x128xbf16>
    %9 = tpu.concatenate %8, %4 in 0 : vector<16x128xbf16>, vector<16x128xbf16> -> vector<32x128xbf16>
    %10 = vector.extract_strided_slice %9 {offsets = [16, 0], sizes = [16, 128], strides = [1, 1]} : vector<32x128xbf16> to vector<16x128xbf16>
    %c0_11 = arith.constant 0 : index
    %c0_12 = arith.constant 0 : index
    %11 = vector.load %arg12[%c0_11, %c0_12] : memref<16x128xbf16, #tpu.memory_space<vmem>>, vector<16x128xbf16>
    tpu.vector_store %arg12[%c0_11, %c0_12], %10 {strides = array<i32>} : memref<16x128xbf16, #tpu.memory_space<vmem>>, vector<16x128xbf16>,
    %12 = vector.extract_strided_slice %9 {offsets = [14, 0], sizes = [16, 128], strides = [1, 1]} : vector<32x128xbf16> to vector<16x128xbf16>
    %13 = vector.extract_strided_slice %9 {offsets = [15, 0], sizes = [16, 128], strides = [1, 1]} : vector<32x128xbf16> to vector<16x128xbf16>
    %14 = vector.extract_strided_slice %9 {offsets = [16, 0], sizes = [16, 128], strides = [1, 1]} : vector<32x128xbf16> to vector<16x128xbf16>
    %15 = tpu.concatenate %12, %13, %14 in 1 : vector<16x128xbf16>, vector<16x128xbf16>, vector<16x128xbf16> -> vector<16x384xbf16>
    %cst = arith.constant dense<0.000000e+00> : vector<16x256xf32>
    %16 = tpu.matmul %15, %5, %cst {dimension_numbers = #tpu.dot_dimension_numbers<[1], [0], [0], [1], [0, 0, 1, 1], [], []>} : vector<16x384xbf16>, vector<384x256xbf16>, vector<16x256xf32> -> vector<16x256xf32>
    %17 = vector.extract_strided_slice %16 {offsets = [0, 0], sizes = [16, 128], strides = [1, 1]} : vector<16x256xf32> to vector<16x128xf32>
    %18 = arith.truncf %17 : vector<16x128xf32> to vector<16x128xbf16>
    %cst_13 = arith.constant dense<0.000000e+00> : vector<16x256xf32>
    %19 = tpu.matmul %18, %6, %cst_13 {dimension_numbers = #tpu.dot_dimension_numbers<[1], [0], [0], [1], [0, 0, 1, 1], [], []>} : vector<16x128xbf16>, vector<128x256xbf16>, vector<16x256xf32> -> vector<16x256xf32>
    %20 = vector.broadcast %7 : vector<1x256xf32> to vector<16x256xf32>
    %21 = arith.addf %19, %20 : vector<16x256xf32>
    %22 = vector.extract_strided_slice %21 {offsets = [0, 0], sizes = [16, 128], strides = [1, 1]} : vector<16x256xf32> to vector<16x128xf32>
    %23 = vector.extract_strided_slice %21 {offsets = [0, 128], sizes = [16, 128], strides = [1, 1]} : vector<16x256xf32> to vector<16x128xf32>
    %24 = arith.negf %23 : vector<16x128xf32>
    %25 = math.exp %24 : vector<16x128xf32>
    %cst_14 = arith.constant 1.000000e+00 : f32
    %26 = vector.broadcast %cst_14 : f32 to vector<16x128xf32>
    %27 = arith.addf %26, %25 : vector<16x128xf32>
    %28 = arith.divf %26, %27 : vector<16x128xf32>
    %29 = arith.mulf %22, %28 : vector<16x128xf32>
    %c0_15 = arith.constant 0 : index
    %c0_16 = arith.constant 0 : index
    %30 = vector.load %arg6[%c0_15, %c0_16] : memref<1x128xf32, #tpu.memory_space<vmem>>, vector<1x128xf32>
    %31 = vector.extract_strided_slice %16 {offsets = [0, 128], sizes = [16, 128], strides = [1, 1]} : vector<16x256xf32> to vector<16x128xf32>
    %32 = vector.broadcast %30 : vector<1x128xf32> to vector<16x128xf32>
    %33 = arith.addf %31, %32 : vector<16x128xf32>
    %34 = arith.addf %29, %33 : vector<16x128xf32>
    %35 = arith.truncf %34 : vector<16x128xf32> to vector<16x128xbf16>
    %c0_17 = arith.constant 0 : index
    %c0_18 = arith.constant 0 : index
    %c0_19 = arith.constant 0 : index
    %36 = vector.load %arg10[%c0_17, %c0_18, %c0_19] : memref<1x16x128xbf16, #tpu.memory_space<vmem>>, vector<1x16x128xbf16>
    %37 = vector.shape_cast %36 : vector<1x16x128xbf16> to vector<16x128xbf16>
    %38 = vector.shape_cast %35 : vector<16x128xbf16> to vector<1x16x128xbf16>
    tpu.vector_store %arg10[%c0_17, %c0_18, %c0_19], %38 {strides = array<i32>} : memref<1x16x128xbf16, #tpu.memory_space<vmem>>, vector<1x16x128xbf16>,
    %c0_20 = arith.constant 0 : index
    %c0_21 = arith.constant 0 : index
    %39 = vector.load %arg7[%c0_20, %c0_21] : memref<384x128xbf16, #tpu.memory_space<vmem>>, vector<384x128xbf16>
    %c0_22 = arith.constant 0 : index
    %c0_23 = arith.constant 0 : index
    %40 = vector.load %arg8[%c0_22, %c0_23] : memref<128x256xbf16, #tpu.memory_space<vmem>>, vector<128x256xbf16>
    %c0_24 = arith.constant 0 : index
    %c0_25 = arith.constant 0 : index
    %41 = vector.load %arg9[%c0_24, %c0_25] : memref<1x256xf32, #tpu.memory_space<vmem>>, vector<1x256xf32>
    %c0_26 = arith.constant 0 : index
    %c0_27 = arith.constant 0 : index
    %42 = vector.load %arg13[%c0_26, %c0_27] : memref<16x128xbf16, #tpu.memory_space<vmem>>, vector<16x128xbf16>
    %43 = tpu.concatenate %42, %35 in 0 : vector<16x128xbf16>, vector<16x128xbf16> -> vector<32x128xbf16>
    %44 = vector.extract_strided_slice %43 {offsets = [16, 0], sizes = [16, 128], strides = [1, 1]} : vector<32x128xbf16> to vector<16x128xbf16>
    %c0_28 = arith.constant 0 : index
    %c0_29 = arith.constant 0 : index
    %45 = vector.load %arg13[%c0_28, %c0_29] : memref<16x128xbf16, #tpu.memory_space<vmem>>, vector<16x128xbf16>
    tpu.vector_store %arg13[%c0_28, %c0_29], %44 {strides = array<i32>} : memref<16x128xbf16, #tpu.memory_space<vmem>>, vector<16x128xbf16>,
    %46 = vector.extract_strided_slice %43 {offsets = [12, 0], sizes = [16, 128], strides = [1, 1]} : vector<32x128xbf16> to vector<16x128xbf16>
    %47 = vector.extract_strided_slice %43 {offsets = [14, 0], sizes = [16, 128], strides = [1, 1]} : vector<32x128xbf16> to vector<16x128xbf16>
    %48 = vector.extract_strided_slice %43 {offsets = [16, 0], sizes = [16, 128], strides = [1, 1]} : vector<32x128xbf16> to vector<16x128xbf16>
    %49 = tpu.concatenate %46, %47, %48 in 1 : vector<16x128xbf16>, vector<16x128xbf16>, vector<16x128xbf16> -> vector<16x384xbf16>
    %cst_30 = arith.constant dense<0.000000e+00> : vector<16x128xf32>
    %50 = tpu.matmul %49, %39, %cst_30 {dimension_numbers = #tpu.dot_dimension_numbers<[1], [0], [0], [1], [0, 0, 1, 1], [], []>} : vector<16x384xbf16>, vector<384x128xbf16>, vector<16x128xf32> -> vector<16x128xf32>
    %51 = arith.truncf %50 : vector<16x128xf32> to vector<16x128xbf16>
    %cst_31 = arith.constant dense<0.000000e+00> : vector<16x256xf32>
    %52 = tpu.matmul %51, %40, %cst_31 {dimension_numbers = #tpu.dot_dimension_numbers<[1], [0], [0], [1], [0, 0, 1, 1], [], []>} : vector<16x128xbf16>, vector<128x256xbf16>, vector<16x256xf32> -> vector<16x256xf32>
    %53 = vector.broadcast %41 : vector<1x256xf32> to vector<16x256xf32>
    %54 = arith.addf %52, %53 : vector<16x256xf32>
    %55 = vector.extract_strided_slice %54 {offsets = [0, 0], sizes = [16, 128], strides = [1, 1]} : vector<16x256xf32> to vector<16x128xf32>
    %56 = vector.extract_strided_slice %54 {offsets = [0, 128], sizes = [16, 128], strides = [1, 1]} : vector<16x256xf32> to vector<16x128xf32>
    %57 = arith.negf %56 : vector<16x128xf32>
    %58 = math.exp %57 : vector<16x128xf32>
    %cst_32 = arith.constant 1.000000e+00 : f32
    %59 = vector.broadcast %cst_32 : f32 to vector<16x128xf32>
    %60 = arith.addf %59, %58 : vector<16x128xf32>
    %61 = arith.divf %59, %60 : vector<16x128xf32>
    %62 = arith.mulf %55, %61 : vector<16x128xf32>
    %63 = arith.extf %35 : vector<16x128xbf16> to vector<16x128xf32>
    %64 = arith.addf %62, %63 : vector<16x128xf32>
    %65 = arith.truncf %64 : vector<16x128xf32> to vector<16x128xbf16>
    %c0_33 = arith.constant 0 : index
    %c0_34 = arith.constant 0 : index
    %c0_35 = arith.constant 0 : index
    %66 = vector.load %arg11[%c0_33, %c0_34, %c0_35] : memref<1x16x128xbf16, #tpu.memory_space<vmem>>, vector<1x16x128xbf16>
    %67 = vector.shape_cast %66 : vector<1x16x128xbf16> to vector<16x128xbf16>
    %68 = vector.shape_cast %65 : vector<16x128xbf16> to vector<1x16x128xbf16>
    tpu.vector_store %arg11[%c0_33, %c0_34, %c0_35], %68 {strides = array<i32>} : memref<1x16x128xbf16, #tpu.memory_space<vmem>>, vector<1x16x128xbf16>,
    return
  }
  func.func @transform_0(%arg0: i32, %arg1: i32) -> (i32, i32, i32) {
    %c0_i32 = arith.constant 0 : i32
    %c0_i32_0 = arith.constant 0 : i32
    return %arg0, %arg1, %c0_i32 : i32, i32, i32
  }
  func.func @transform_1(%arg0: i32, %arg1: i32) -> (i32, i32) {
    %c0_i32 = arith.constant 0 : i32
    %c0_i32_0 = arith.constant 0 : i32
    %c0_i32_1 = arith.constant 0 : i32
    return %c0_i32, %c0_i32_0 : i32, i32
  }
  func.func @transform_2(%arg0: i32, %arg1: i32) -> (i32, i32) {
    %c0_i32 = arith.constant 0 : i32
    %c0_i32_0 = arith.constant 0 : i32
    %c0_i32_1 = arith.constant 0 : i32
    return %c0_i32, %c0_i32_0 : i32, i32
  }
  func.func @transform_3(%arg0: i32, %arg1: i32) -> (i32, i32) {
    %c0_i32 = arith.constant 0 : i32
    %c0_i32_0 = arith.constant 0 : i32
    %c0_i32_1 = arith.constant 0 : i32
    return %c0_i32, %c0_i32_0 : i32, i32
  }
  func.func @transform_4(%arg0: i32, %arg1: i32) -> (i32, i32) {
    %c0_i32 = arith.constant 0 : i32
    %c0_i32_0 = arith.constant 0 : i32
    %c0_i32_1 = arith.constant 0 : i32
    return %c0_i32, %c0_i32_0 : i32, i32
  }
  func.func @transform_5(%arg0: i32, %arg1: i32) -> (i32, i32) {
    %c0_i32 = arith.constant 0 : i32
    %c0_i32_0 = arith.constant 0 : i32
    %c0_i32_1 = arith.constant 0 : i32
    return %c0_i32, %c0_i32_0 : i32, i32
  }
  func.func @transform_6(%arg0: i32, %arg1: i32) -> (i32, i32) {
    %c0_i32 = arith.constant 0 : i32
    %c0_i32_0 = arith.constant 0 : i32
    %c0_i32_1 = arith.constant 0 : i32
    return %c0_i32, %c0_i32_0 : i32, i32
  }
  func.func @transform_7(%arg0: i32, %arg1: i32) -> (i32, i32) {
    %c0_i32 = arith.constant 0 : i32
    %c0_i32_0 = arith.constant 0 : i32
    %c0_i32_1 = arith.constant 0 : i32
    return %c0_i32, %c0_i32_0 : i32, i32
  }
  func.func @transform_8(%arg0: i32, %arg1: i32) -> (i32, i32, i32) {
    %c0_i32 = arith.constant 0 : i32
    %c0_i32_0 = arith.constant 0 : i32
    return %arg0, %arg1, %c0_i32 : i32, i32, i32
  }
  func.func @transform_9(%arg0: i32, %arg1: i32) -> (i32, i32, i32) {
    %c0_i32 = arith.constant 0 : i32
    %c0_i32_0 = arith.constant 0 : i32
    return %arg0, %arg1, %c0_i32 : i32, i32, i32
  }
}

</mosaic_0001>

<bundles_post_ra>
// kernel: tpu_custom_call.1
= control target key start
LH: loop header
LB: loop body
LE: loop exit
PB: predicated region body
PF: predicated region fallthrough
CT: control target
= control target key end

     0   :  { %s3182_s0 = inlined_call_operand.hbm [shape: bf16[2,48,128], index: 0, kind: input, shape index: {}]   ;;  %s3183_s1 = inlined_call_operand.hbm [shape: bf16[384,256], index: 1, kind: input, shape index: {}]   ;;  %s3184_s2 = inlined_call_operand.hbm [shape: bf16[128,256], index: 2, kind: input, shape index: {}]   ;;  %s3185_s3 = inlined_call_operand.vmem [shape: f32[1,256], index: 3, kind: input, shape index: {}]   ;;  %s3186_s4 = inlined_call_operand.hbm [shape: f32[1,128], index: 4, kind: input, shape index: {}]   ;;  %s3187_s5 = inlined_call_operand.hbm [shape: bf16[384,128], index: 5, kind: input, shape index: {}]   ;;  %s3188_s6 = inlined_call_operand.hbm [shape: bf16[128,256], index: 6, kind: input, shape index: {}]   ;;  %s3189_s7 = inlined_call_operand.vmem [shape: f32[1,256], index: 7, kind: input, shape index: {}]   ;;  %s3190_s8 = inlined_call_operand.hbm [shape: bf16[2,48,128], index: 8, kind: output, shape index: {0}]   ;;  %s3191_s9 = inlined_call_operand.hbm [shape: bf16[2,48,128], index: 9, kind: output, shape index: {1}]  }
   0x1   :  { %3200 = sst [smem:[#allocation27_spill]] %s3183_s1 }
   0x2   :  { %3201 = sst [smem:[#allocation28_spill]] %s3184_s2 }
   0x3   :  { %3202 = sst [smem:[#allocation29_spill]] %s3186_s4 }
   0x4   :  { %3203 = sst [smem:[#allocation30_spill]] %s3187_s5 }
   0x5   :  { %3204 = sst [smem:[#allocation31_spill]] %s3188_s6 }
   0x6   :  { %3205 = sst [smem:[#allocation32_spill]] %s3189_s7 }
   0x7   :  { %3206 = sst [smem:[#allocation33_spill]] %s3190_s8 }
   0x8   :  { %3207 = sst [smem:[#allocation34_spill]] %s3191_s9 }
   0x9   :  { %15 = vsyncpa [#allocation5], 0 }
   0xa   :  { %17 = vsyncpa [#allocation5 + $0x1], 0 }
   0xb   :  { %18 = vsyncpa [#allocation8], 0 }
   0xc   :  { %19 = vsyncpa [#allocation11], 0 }
   0xd   :  { %20 = vsyncpa [#allocation14], 0 }
   0xe   :  { %21 = vsyncpa [#allocation6], 0 }
   0xf   :  { %23 = vsyncpa [#allocation6 + $0x1], 0 }
  0x10   :  { %24 = vsyncpa [#allocation17], 0 }
  0x11   :  { %26 = vsyncpa [#allocation17 + $0x1], 0  ;;  %s2867_s30 = smov 0   ;;  %s2869_s10 = smov 0  }
  0x12   :  { %s2871_s11 = smov 0   ;;  %s2873_s12 = smov 0  }
  0x13   :  { %s2875_s13 = smov 0   ;;  %s2877_s14 = smov 0  }
  0x14   :  { %s2879_s15 = smov 0   ;;  %s2881_s16 = smov 0  }
  0x15 LB: > { %s3192_s17 = sadd.s32 4294967295, %s2803_s16   ;;  %p1743_p0 = scmp.ge.s32.totalorder %s2803_s16, 1  ;;  %s2803_s16 = sphi %s2881_s16, %s32_s16   ;;  %s2799_s15 = sphi %s2879_s15, %s3237_s15   ;;  %s2795_s14 = sphi %s2877_s14, %s3236_s14   ;;  %s2791_s13 = sphi %s2875_s13, %s3235_s13   ;;  %s2787_s12 = sphi %s2873_s12, %s3234_s12   ;;  %s2783_s11 = sphi %s2871_s11, %s3233_s11   ;;  %s2779_s10 = sphi %s2869_s10, %s3232_s10   ;;  %s2775_s30 = sphi %s2867_s30, %s3231_s30  }
  0x16   : > { %p2911_p1 = scmp.eq.s32.totalorder %s3192_s17, 0  ;;  %p280_p2 = scmp.lt.s32.totalorder %s2803_s16, 7 }
  0x17   : > { %s3209_s1 = sld [smem:[#allocation27_spill]]  ;;  %s2805_s23 = smov [#allocation7]  }
  0x18   : > { %p2919_p3 = pnand %p1743_p0, %p280_p2  ;;  %s293_s24 = sshll.u32 %s2805_s23, 4  ;;  %s294_s24 = int_to_ptr.vmem [resolvable:$true] %s293_s24 }
  0x19   : > { %s3212_s4 = sld [smem:[#allocation29_spill]]  ;;  %s2806_s29 = smov 128  }
  0x1a   : > { %p2349_p4 = pneg %p2919_p3  ;;  %s2807_s19 = smov 8  }
  0x1b   : > { %s2808_s20 = smov [#allocation10]   ;;  %s3213_s2 = sld [smem:[#allocation28_spill]] }
  0x1c   : > { %p2927_p5 = pnand %p2349_p4, %p2911_p1  ;;  %s325_s23 = sshll.u32 %s2808_s20, 4  ;;  %s326_s23 = int_to_ptr.vmem [resolvable:$true] %s325_s23 }
  0x1d   : > { %s291_s21 = sshll.u32 %s3209_s1, 4  ;;  %s3214_s5 = sld [smem:[#allocation30_spill]]  ;;  %s292_s21 = int_to_ptr.hbm [resolvable:$true] %s291_s21 }
  0x1e   : > { %2352 = dma.hbm_to_vmem [thread:$0]  (!%p2927_p5), %s292_s21, 6144, %s294_s24, [#allocation8], %s2806_s29, %s2806_s29, %s2807_s19  }
  0x1f   : > { %s323_s28 = sshll.u32 %s3212_s4, 4  ;;  %s2809_s7 = smov [#allocation9]   ;;  %s324_s28 = int_to_ptr.hbm [resolvable:$true] %s323_s28 }
  0x20   : > { %2358 = dma.hbm_to_vmem [thread:$0]  (!%p2927_p5), %s324_s28, 16, %s326_s23, [#allocation11]  }
  0x21   : > { %s305_s9 = sshll.u32 %s3213_s2, 4  ;;  %s307_s8 = sshll.u32 %s2809_s7, 4  ;;  %s306_s9 = int_to_ptr.hbm [resolvable:$true] %s305_s9  ;;  %s308_s8 = int_to_ptr.vmem [resolvable:$true] %s307_s8 }
  0x22   : > { %2355 = dma.hbm_to_vmem [thread:$0]  (!%p2927_p5), %s306_s9, 2048, %s308_s8, [#allocation8], %s2806_s29, %s2806_s29, %s2807_s19  }
  0x23   : > { %s334_s4 = sshll.u32 %s3214_s5, 4  ;;  %s2810_s1 = smov [#allocation12]   ;;  %s335_s4 = int_to_ptr.hbm [resolvable:$true] %s334_s4 }
  0x24   : > { %s336_s17 = sshll.u32 %s2810_s1, 4  ;;  %s3195_s21 = smov 64   ;;  %s337_s17 = int_to_ptr.vmem [resolvable:$true] %s336_s17 }
  0x25   : > { %s3196_s24 = smov 4   ;;  %s3215_s6 = sld [smem:[#allocation31_spill]] }
  0x26   : > { %2361 = dma.hbm_to_vmem [thread:$0]  (!%p2927_p5), %s335_s4, 3072, %s337_s17, [#allocation11], %s3195_s21, %s3195_s21, %s3196_s24  }
  0x27   : > { %s2813_s9 = smov [#allocation13]   ;;  %s1742_s23 = sadd.s32 4294967294, %s2803_s16  }
  0x28   : > { %s350_s20 = sshll.u32 %s2813_s9, 4  ;;  %s41_s26 = sadd.s32 1, %s2795_s14  ;;  %s351_s20 = int_to_ptr.vmem [resolvable:$true] %s350_s20 }
  0x29   : > { %p42_p6 = scmp.ge.s32.totalorder %s41_s26, 3  ;;  %s44_s4 = sadd.s32 1, %s2799_s15 }
  0x2a   : > { %s53_s27 = sadd.s32 1, %s2783_s11  ;;  %p60_p7 = scmp.ne.s32.totalorder %s2783_s11, %s2779_s10 }
  0x2b   : > { %s348_s8 = sshll.u32 %s3215_s6, 4  ;;  %s3239_s26 = smov (%p42_p6, %s41_s26), 0  ;;  %s349_s8 = int_to_ptr.hbm [resolvable:$true] %s348_s8 }
  0x2c   : > { %2364 = dma.hbm_to_vmem [thread:$0]  (!%p2927_p5), %s349_s8, 2048, %s351_s20, [#allocation14], %s2806_s29, %s2806_s29, %s2807_s19  }
  0x2d   : > { %3216 = sst [smem:[#allocation24_spill]] %s3239_s26  ;;  %s3241_s4 = smov (!%p42_p6, %s44_s4), %s2799_s15 }
  0x2e   : > { %s49_s25 = ssub.s32 %s2795_s14, %s3239_s26  ;;  %p61_p8 = scmp.eq.s32.totalorder %s2803_s16, 0 }
  0x2f   : > { %p46_p9 = scmp.ge.s32.totalorder %s3241_s4, 2  ;;  %p66_p10 = scmp.ne.s32.totalorder %s2779_s10, %s2775_s30 }
  0x30   : > { %s3217_s29 = sadd.s32 4294967295, %s2803_s16   ;;  %p245_p12 = scmp.eq.s32.totalorder %s1742_s23, 5 }
  0x31   : > { %p239_p11 = scmp.eq.s32.totalorder %s3217_s29, 5  ;;  %s3243_s4 = smov (%p46_p9, %s3241_s4), 0 }
  0x32   : > { %3218 = sst [smem:[#allocation25_spill]] %s3243_s4  ;;  %p2976_p13 = por %p2911_p1, %p66_p10 }
  0x33   : > { %p2983_p0 = por %p239_p11, %p60_p7  ;;  %s48_s17 = ssub.s32 %s2799_s15, %s3243_s4 }
  0x34   : > { %p2989_p2 = por %p245_p12, %p66_p10  ;;  %s50_s28 = sor.u32 %s49_s25, %s48_s17 }
  0x35   : > { %p62_p4 = por %p61_p8, %p60_p7  ;;  %p51_p5 = scmp.eq.s32.totalorder %s50_s28, 0 }
  0x36   : > { %s3221_s7 = scalar_select %p2989_p2, 1, 0 }
  0x37   : > { %s367_s8 = sand.u32 1, %s2783_s11   ;;  %p2381_p6 = scmp.lt.s32.totalorder %s2803_s16, 6 }
  0x38   : > { %3222 = sst [smem:[#allocation26_spill]] %s3221_s7  ;;  %s1750_s9 = sshll.u32 %s367_s8, 3 }
  0x39   : > { %s2999_s20 = scalar_select %p51_p5, %s2783_s11, %s53_s27  }
  0x3a   : > { %s1751_s23 = sshll.u32 %s2795_s14, 1  ;;  %s2320_s29 = smul.u32 6, %s2799_s15 }
  0x3b   : > { %s371_s21 = scalar_lea.vmem [#allocation4], %s1750_s9  ;;  %p2366_p9 = pnand %p2381_p6, %p62_p4 }
  0x3c   : > { %s381_s24 = sshll.u32 %s371_s21, 4  ;;  %s376_s2 = sadd.s32 %s2320_s29, %s1751_s23  ;;  %s382_s24 = int_to_ptr.vmem [resolvable:$true] %s381_s24 }
  0x3d   : > { %s1752_s5 = sshll.u32 %s376_s2, 2  ;;  %s368_s17 = scalar_lea.sflag [#allocation5], %s367_s8 }
  0x3e   : > { %s378_s26 = scalar_lea.hbm %s3182_s0, %s1752_s5  ;;  %s3223_s28 = smov 4  }
  0x3f   : > { %s379_s25 = sshll.u32 %s378_s26, 4  ;;  %s3224_s7 = smov 64   ;;  %s380_s25 = int_to_ptr.hbm [resolvable:$true] %s379_s25 }
  0x40   : > { %2368 = dma.hbm_to_vmem [thread:$0]  (!%p2366_p9), %s380_s25, 128, %s382_s24, %s368_s17, %s3224_s7, %s3224_s7, %s3223_s28  }
  0x41   : > { %393 = sbr.rel (%p2919_p3) target bundleno = 769 (0x301), region = 52  ;;  %s3012_s21 = sand.u32 (!%p2919_p3), 1, %s2779_s10  }
  0x42   : > { %s3015_s2 = sshll.u32 (!%p2919_p3), %s3012_s21, 3  ;;  %s396_s5 = scalar_lea.sflag (!%p2919_p3), [#allocation5], %s3012_s21 }
  0x43   : > { %s399_s6 = scalar_lea.vmem (!%p2919_p3), [#allocation4], %s3015_s2 }
  0x46   : > { %2750 = dma.done.wait (%p2976_p13), %s396_s5, 128  }
  0x47   : > { %2752 = vsyncadd (%p2976_p13), %s396_s5, 4294967168 }
  0x48   : > { %2754 = dma.done.wait (%p2911_p1), [#allocation8], 8192  }
  0x49   : > { %2756 = vsyncadd (%p2911_p1), [#allocation8], 4294959104 }
  0x4a   : > { %2758 = dma.done.wait (%p2911_p1), [#allocation11], 3088  }
  0x4b   : > { %2760 = vsyncadd (%p2911_p1), [#allocation11], 4294964208 }
  0x4c   : > { %2762 = dma.done.wait (%p2911_p1), [#allocation14], 2048  }
  0x4d   : > { %2764 = vsyncadd (%p2911_p1), [#allocation14], 4294965248  ;;  %s457_s22 = scalar_lea.vmem [#allocation15], %s3015_s2  ;;  %s464_s24 = scalar_lea.vmem [#allocation16], %s3015_s2 }
  0x4e   : > { %p1762_p3 = scmp.ne.s32.totalorder %s2787_s12, 0 }
  0x50   : > { %472 = sbr.rel (%p1762_p3) target bundleno = 90 (0x5a), region = 80 }
  0x55   : > { %v2814_v0 = vmov 0  }
  0x56   : > { %473 = vst [vmem:[#allocation2] sm:$0xf] %v2814_v0 }
  0x57   : > { %474 = vst [vmem:[#allocation2 + $0x4] sm:$0xf] %v2814_v0 }
  0x58   : > { %475 = vst [vmem:[#allocation3] sm:$0xf] %v2814_v0 }
  0x59   : > { %476 = vst [vmem:[#allocation3 + $0x4] sm:$0xf] %v2814_v0 }
  0x5a PF: > { %v1825_v1 = vld [vmem:[#allocation7 + $0x70] sm:$0xf]  ;;  %v2215_v2 = vld [vmem:[#allocation7 + $0x74] sm:$0xf0]  ;;  %v1817_v10 = vld [vmem:[#allocation7 + $0x60] sm:$0xf] }
  0x5b   : > { %v1889_v3 = vld [vmem:[#allocation7 + $0xf0] sm:$0xf]  ;;  %v1826_v4 = vor.u32 %v2215_v2, %v1825_v1  ;;  %v2231_v5 = vld [vmem:[#allocation7 + $0xf4] sm:$0xf0]  ;;  %v2213_v11 = vld [vmem:[#allocation7 + $0x64] sm:$0xf0] }
  0x5c   : > { %v1953_v6 = vld [vmem:[#allocation7 + $0x170] sm:$0xf]  ;;  %v2247_v7 = vld [vmem:[#allocation7 + $0x174] sm:$0xf0]  ;;  %v1890_v8 = vor.u32 %v2231_v5, %v1889_v3  ;;  %v1881_v12 = vld [vmem:[#allocation7 + $0xe0] sm:$0xf]  ;;  %v1818_v13 = vor.u32 %v2213_v11, %v1817_v10 }
  0x5d   : > { %v1954_v9 = vor.u32 %v2247_v7, %v1953_v6  ;;  %827 = vmatpush.bf16.msra.mxu0 %v1826_v4  ;;  %v2229_v14 = vld [vmem:[#allocation7 + $0xe4] sm:$0xf0]  ;;  %v1945_v15 = vld [vmem:[#allocation7 + $0x160] sm:$0xf]  ;;  %v1809_v19 = vld [vmem:[#allocation7 + $0x50] sm:$0xf] }
  0x5e   : > { %v2245_v16 = vld [vmem:[#allocation7 + $0x164] sm:$0xf0]  ;;  %841 = vmatpush.bf16.msra.mxu1 %v1890_v8  ;;  %v1882_v17 = vor.u32 %v2229_v14, %v1881_v12  ;;  %v2211_v20 = vld [vmem:[#allocation7 + $0x54] sm:$0xf0]  ;;  %v1873_v21 = vld [vmem:[#allocation7 + $0xd0] sm:$0xf] }
  0x5f   : > { %855 = vmatpush.bf16.msra.mxu2 %v1954_v9  ;;  %v1946_v18 = vor.u32 %v2245_v16, %v1945_v15  ;;  %v2227_v22 = vld [vmem:[#allocation7 + $0xd4] sm:$0xf0]  ;;  %v1937_v23 = vld [vmem:[#allocation7 + $0x150] sm:$0xf]  ;;  %v1810_v25 = vor.u32 %v2211_v20, %v1809_v19  ;;  %v1801_v28 = vld [vmem:[#allocation7 + $0x40] sm:$0xf] }
  0x60   : > { %v2243_v24 = vld [vmem:[#allocation7 + $0x154] sm:$0xf0]  ;;  %v1874_v26 = vor.u32 %v2227_v22, %v1873_v21  ;;  %v2209_v29 = vld [vmem:[#allocation7 + $0x44] sm:$0xf0]  ;;  %v1865_v30 = vld [vmem:[#allocation7 + $0xc0] sm:$0xf] }
  0x61   : > { %828 = vmatpush.bf16.msra.mxu0 %v1818_v13  ;;  %v1938_v27 = vor.u32 %v2243_v24, %v1937_v23  ;;  %v2225_v31 = vld [vmem:[#allocation7 + $0xc4] sm:$0xf0]  ;;  %v1929_v32 = vld [vmem:[#allocation7 + $0x140] sm:$0xf]  ;;  %v1802_v34 = vor.u32 %v2209_v29, %v1801_v28  ;;  %v1793_v37 = vld [vmem:[#allocation7 + $0x30] sm:$0xf] }
  0x62   : > { %842 = vmatpush.bf16.msra.mxu1 %v1882_v17  ;;  %v2241_v33 = vld [vmem:[#allocation7 + $0x144] sm:$0xf0]  ;;  %v1866_v35 = vor.u32 %v2225_v31, %v1865_v30  ;;  %v2207_v38 = vld [vmem:[#allocation7 + $0x34] sm:$0xf0]  ;;  %v1857_v39 = vld [vmem:[#allocation7 + $0xb0] sm:$0xf] }
  0x63   : > { %856 = vmatpush.bf16.msra.mxu2 %v1946_v18  ;;  %v1930_v36 = vor.u32 %v2241_v33, %v1929_v32  ;;  %v2223_v40 = vld [vmem:[#allocation7 + $0xb4] sm:$0xf0]  ;;  %v1921_v41 = vld [vmem:[#allocation7 + $0x130] sm:$0xf]  ;;  %v1785_v43 = vld [vmem:[#allocation7 + $0x20] sm:$0xf]  ;;  %v1794_v44 = vor.u32 %v2207_v38, %v1793_v37 }
  0x64   : > { %v2239_v42 = vld [vmem:[#allocation7 + $0x134] sm:$0xf0]  ;;  %v2205_v45 = vld [vmem:[#allocation7 + $0x24] sm:$0xf0]  ;;  %v1849_v46 = vld [vmem:[#allocation7 + $0xa0] sm:$0xf]  ;;  %v1858_v48 = vor.u32 %v2223_v40, %v1857_v39 }
  0x65   : > { %829 = vmatpush.bf16.msra.mxu0 %v1810_v25  ;;  %v2221_v47 = vld [vmem:[#allocation7 + $0xa4] sm:$0xf0]  ;;  %v1922_v49 = vor.u32 %v2239_v42, %v1921_v41  ;;  %v1913_v50 = vld [vmem:[#allocation7 + $0x120] sm:$0xf]  ;;  %v3040_v52 = vld [vmem:[%s399_s6] sm:$0xff]   ;;  %v1786_v62 = vor.u32 %v2205_v45, %v1785_v43  ;;  %vm575_vm1 = vcmask 1040384  }
  0x66   : > { %843 = vmatpush.bf16.msra.mxu1 %v1874_v26  ;;  %v2237_v51 = vld [vmem:[#allocation7 + $0x124] sm:$0xf0]  ;;  %v2308_v53 = vunpack.c.l.b16 %v3040_v52  ;;  %v2309_v54 = vunpack.c.h.b16 %v3040_v52  ;;  %v3044_v55 = vld [vmem:[#allocation2] sm:$0xff]  ;;  %v567_v56 = vshll.u32 %v3040_v52, 16  ;;  %v2214_v57 = vld [vmem:[#allocation7 + $0x74] sm:$0xf]  ;;  %v1850_v5 = vor.u32 %v2221_v47, %v1849_v46 }
  0x67   : > { %857 = vmatpush.bf16.msra.mxu2 %v1938_v27  ;;  %v1827_v58 = vld [vmem:[#allocation7 + $0x78] sm:$0xf0]  ;;  %v1777_v59 = vld [vmem:[#allocation7 + $0x10] sm:$0xf]  ;;  %v2203_v60 = vld [vmem:[#allocation7 + $0x14] sm:$0xf0]  ;;  %v1914_v6 = vor.u32 %v2237_v51, %v1913_v50 }
  0x68   : > { %v2212_v61 = vld [vmem:[#allocation7 + $0x64] sm:$0xf]  ;;  %v1841_v63 = vld [vmem:[#allocation7 + $0x90] sm:$0xf]  ;;  %v2219_v0 = vld [vmem:[#allocation7 + $0x94] sm:$0xf0]  ;;  %v556_v1 = vpack.c.b16 %v2308_v53, %v2308_v53  ;;  %v557_v2 = vpack.c.b16 %v2309_v54, %v2309_v54  ;;  %v1830_v3 = vor.u32 %v2214_v57, %v1827_v58  ;;  %v1778_v15 = vor.u32 %v2203_v60, %v1777_v59 }
  0x69   : > { %830 = vmatpush.bf16.msra.mxu0 %v1802_v34  ;;  %v1819_v4 = vld [vmem:[#allocation7 + $0x68] sm:$0xf0]  ;;  %v1905_v7 = vld [vmem:[#allocation7 + $0x110] sm:$0xf]  ;;  %v2235_v8 = vld [vmem:[#allocation7 + $0x114] sm:$0xf0]  ;;  %v1842_v18 = vor.u32 %v2219_v0, %v1841_v63 }
  0x6a   : > { %844 = vmatpush.bf16.msra.mxu1 %v1866_v35  ;;  %v569_v9 = vrot.slane %v567_v56, 1  ;;  %v571_v10 = vshrl.u32 %v3040_v52, 16  ;;  %560 = vst [vmem:[#allocation2] sm:$0xf] %v556_v1  ;;  %v564_v11 = vshrl.u32 %v3044_v55, 16  ;;  %869 = vmatpush.bf16.msra.mxu3 %v1830_v3  ;;  %v1822_v12 = vor.u32 %v2212_v61, %v1819_v4  ;;  %s2321_s4 = smul.u32 6, %s2791_s13 }
  0x6b   : > { %858 = vmatpush.bf16.msra.mxu2 %v1930_v36  ;;  %vm562_vm0 = vsmask.f32 7424  ;;  %561 = vst [vmem:[#allocation2 + $0x4] sm:$0xf] %v557_v2  ;;  %v2210_v13 = vld [vmem:[#allocation7 + $0x54] sm:$0xf]  ;;  %v1906_v19 = vor.u32 %v2235_v8, %v1905_v7 }
  0x6c   : > { %v1811_v14 = vld [vmem:[#allocation7 + $0x58] sm:$0xf0]  ;;  %v1769_v16 = vld [vmem:[#allocation7] sm:$0xf]  ;;  %v2201_v17 = vld [vmem:[#allocation7 + $0x4] sm:$0xf0]  ;;  %v573_v23 = vor.u32 %v571_v10, %v569_v9  ;;  %v570_v26 = vsel %vm562_vm0, %v564_v11, %v569_v9 }
  0x6d   : > { %831 = vmatpush.bf16.msra.mxu0 %v1794_v44  ;;  %v1833_v20 = vld [vmem:[#allocation7 + $0x80] sm:$0xf]  ;;  %v2217_v21 = vld [vmem:[#allocation7 + $0x84] sm:$0xf0]  ;;  %v577_v25 = vrot.slane %v3040_v52, 7  ;;  %v1814_v27 = vor.u32 %v2210_v13, %v1811_v14  ;;  %v1770_v32 = vor.u32 %v2201_v17, %v1769_v16  ;;  %v576_v34 = vrot.slane %v3044_v55, 7 }
  0x6e   : > { %845 = vmatpush.bf16.msra.mxu1 %v1858_v48  ;;  %v1897_v22 = vld [vmem:[#allocation7 + $0x100] sm:$0xf]  ;;  %v2233_v24 = vld [vmem:[#allocation7 + $0x104] sm:$0xf0]  ;;  %870 = vmatpush.bf16.msra.mxu3 %v1822_v12  ;;  %v2230_v28 = vld [vmem:[#allocation7 + $0xf4] sm:$0xf]  ;;  %v1834_v33 = vor.u32 %v2217_v21, %v1833_v20 }
  0x6f   : > { %859 = vmatpush.bf16.msra.mxu2 %v1922_v49  ;;  %v1891_v29 = vld [vmem:[#allocation7 + $0xf8] sm:$0xf0]  ;;  %v2208_v30 = vld [vmem:[#allocation7 + $0x44] sm:$0xf]  ;;  %v1803_v31 = vld [vmem:[#allocation7 + $0x48] sm:$0xf0]  ;;  %v1898_v38 = vor.u32 %v2233_v24, %v1897_v22  ;;  %v3054_v48 = vsel %vm575_vm1, %v576_v34, %v577_v25 }
  0x70   : > { %v574_v35 = vrot.slane %v3040_v52, 1  ;;  %v2246_v36 = vld [vmem:[#allocation7 + $0x174] sm:$0xf]  ;;  %v1955_v37 = vld [vmem:[#allocation7 + $0x178] sm:$0xf0]  ;;  %v579_v39 = vrot.slane %v570_v26, 7  ;;  %v1894_v41 = vor.u32 %v2230_v28, %v1891_v29  ;;  %v1806_v42 = vor.u32 %v2208_v30, %v1803_v31 }
  0x71   : > { %832 = vmatpush.bf16.msra.mxu0 %v1786_v62  ;;  %v580_v40 = vrot.slane %v573_v23, 7  ;;  %v2228_v43 = vld [vmem:[#allocation7 + $0xe4] sm:$0xf]  ;;  %v1958_v44 = vor.u32 %v2246_v36, %v1955_v37  ;;  %v1883_v45 = vld [vmem:[#allocation7 + $0xe8] sm:$0xf0]  ;;  %vm1165_vm10 = vcmask 1041408  }
  0x72   : > { %846 = vmatpush.bf16.msra.mxu1 %v1850_v5  ;;  %871 = vmatpush.bf16.msra.mxu3 %v1814_v27  ;;  %v2206_v46 = vld [vmem:[#allocation7 + $0x34] sm:$0xf]  ;;  %v1795_v47 = vld [vmem:[#allocation7 + $0x38] sm:$0xf0]  ;;  %v3056_v49 = vrot.slane %v574_v35, 7  ;;  %v1886_v55 = vor.u32 %v2228_v43, %v1883_v45  ;;  %vm1160_vm11 = vcmask 1046528  }
  0x73   : > { %860 = vmatpush.bf16.msra.mxu2 %v1914_v6  ;;  %v2244_v50 = vld [vmem:[#allocation7 + $0x164] sm:$0xf]  ;;  %v1947_v51 = vld [vmem:[#allocation7 + $0x168] sm:$0xf0]  ;;  %v3059_v52 = vsel %vm575_vm1, %v579_v39, %v580_v40  ;;  %v2017_v53 = vld [vmem:[#allocation9 + $0x70] sm:$0xf]  ;;  %v1798_v56 = vor.u32 %v2206_v46, %v1795_v47 }
  0x74   : > { %v2263_v54 = vld [vmem:[#allocation9 + $0x74] sm:$0xf0]  ;;  %v2226_v57 = vld [vmem:[#allocation7 + $0xd4] sm:$0xf]  ;;  %v1875_v58 = vld [vmem:[#allocation7 + $0xd8] sm:$0xf0]  ;;  %v1950_v60 = vor.u32 %v2244_v50, %v1947_v51 }
  0x75   : > { %833 = vmatpush.bf16.msra.mxu0 %v1778_v15  ;;  %v2018_v59 = vor.u32 %v2263_v54, %v2017_v53  ;;  %v2204_v61 = vld [vmem:[#allocation7 + $0x24] sm:$0xf]  ;;  %v1787_v62 = vld [vmem:[#allocation7 + $0x28] sm:$0xf0]  ;;  %v2009_v63 = vld [vmem:[#allocation9 + $0x60] sm:$0xf]  ;;  %v1878_v4 = vor.u32 %v2226_v57, %v1875_v58 }
  0x76   : > { %847 = vmatpush.bf16.msra.mxu1 %v1842_v18  ;;  %872 = vmatpush.bf16.msra.mxu3 %v1806_v42  ;;  %v2242_v0 = vld [vmem:[#allocation7 + $0x154] sm:$0xf]  ;;  %v1939_v1 = vld [vmem:[#allocation7 + $0x158] sm:$0xf0]  ;;  %v2261_v2 = vld [vmem:[#allocation9 + $0x64] sm:$0xf0]  ;;  %v1790_v5 = vor.u32 %v2204_v61, %v1787_v62 }
  0x77   : > { %861 = vmatpush.bf16.msra.mxu2 %v1906_v19  ;;  %v2010_v3 = vor.u32 %v2261_v2, %v2009_v63  ;;  %v2224_v6 = vld [vmem:[#allocation7 + $0xc4] sm:$0xf]  ;;  %v2001_v7 = vld [vmem:[#allocation9 + $0x50] sm:$0xf]  ;;  %v2259_v8 = vld [vmem:[#allocation9 + $0x54] sm:$0xf0]  ;;  %v1942_v9 = vor.u32 %v2242_v0, %v1939_v1 }
  0x78   : > { %v1867_v10 = vld [vmem:[#allocation7 + $0xc8] sm:$0xf0]  ;;  %v2202_v11 = vld [vmem:[#allocation7 + $0x14] sm:$0xf]  ;;  %v1779_v12 = vld [vmem:[#allocation7 + $0x18] sm:$0xf0]  ;;  %v2002_v15 = vor.u32 %v2259_v8, %v2001_v7 }
  0x79   : > { %834 = vmatpush.bf16.msra.mxu0 %v1770_v32  ;;  %v2240_v13 = vld [vmem:[#allocation7 + $0x144] sm:$0xf]  ;;  %v1931_v14 = vld [vmem:[#allocation7 + $0x148] sm:$0xf0]  ;;  %v1870_v16 = vor.u32 %v2224_v6, %v1867_v10  ;;  %v1782_v17 = vor.u32 %v2202_v11, %v1779_v12  ;;  %v2222_v18 = vld [vmem:[#allocation7 + $0xb4] sm:$0xf] }
  0x7a   : > { %848 = vmatpush.bf16.msra.mxu1 %v1834_v33  ;;  %873 = vmatpush.bf16.msra.mxu3 %v1798_v56  ;;  %v1859_v19 = vld [vmem:[#allocation7 + $0xb8] sm:$0xf0]  ;;  %v1934_v20 = vor.u32 %v2240_v13, %v1931_v14  ;;  %v2200_v21 = vld [vmem:[#allocation7 + $0x4] sm:$0xf]  ;;  %v1771_v22 = vld [vmem:[#allocation7 + $0x8] sm:$0xf0] }
  0x7b   : > { %862 = vmatpush.bf16.msra.mxu2 %v1898_v38  ;;  %v2238_v23 = vld [vmem:[#allocation7 + $0x134] sm:$0xf]  ;;  %v1923_v24 = vld [vmem:[#allocation7 + $0x138] sm:$0xf0]  ;;  %v1862_v27 = vor.u32 %v2222_v18, %v1859_v19  ;;  %v1774_v28 = vor.u32 %v2200_v21, %v1771_v22  ;;  %v2220_v31 = vld [vmem:[#allocation7 + $0xa4] sm:$0xf] }
  0x7c   : > { %835 = vmatmul.bf16.vlgmr.msra.gmra.mxu0 %v3054_v48  ;;  %v2262_v25 = vld [vmem:[#allocation9 + $0x74] sm:$0xf]  ;;  %v2019_v26 = vld [vmem:[#allocation9 + $0x78] sm:$0xf0]  ;;  %v1926_v29 = vor.u32 %v2238_v23, %v1923_v24  ;;  %v1851_v32 = vld [vmem:[#allocation7 + $0xa8] sm:$0xf0] }
  0x7d   : > { %883 = vmatpush.bf16.msrb.mxu0 %v1894_v41  ;;  %849 = vmatmul.bf16.vlgmr.msra.gmra.mxu1 %v3059_v52  ;;  %v2022_v30 = vor.u32 %v2262_v25, %v2019_v26  ;;  %v2236_v33 = vld [vmem:[#allocation7 + $0x124] sm:$0xf]  ;;  %v1915_v34 = vld [vmem:[#allocation7 + $0x128] sm:$0xf0]  ;;  %v1854_v37 = vor.u32 %v2220_v31, %v1851_v32  ;;  %v2218_v40 = vld [vmem:[#allocation7 + $0x94] sm:$0xf] }
  0x7e   : > { %897 = vmatpush.bf16.msrb.mxu1 %v1958_v44  ;;  %863 = vmatmul.bf16.vlgmr.msra.gmra.mxu2 %v3056_v49  ;;  %v2260_v35 = vld [vmem:[#allocation9 + $0x64] sm:$0xf]  ;;  %v2011_v36 = vld [vmem:[#allocation9 + $0x68] sm:$0xf0]  ;;  %v1918_v38 = vor.u32 %v2236_v33, %v1915_v34  ;;  %v1843_v41 = vld [vmem:[#allocation7 + $0x98] sm:$0xf0] }
  0x7f   : > { %997 = vmatpush.bf16.msrb.mxu2 %v2018_v59  ;;  %874 = vmatpush.bf16.msra.mxu3 %v1790_v5  ;;  %v2014_v39 = vor.u32 %v2260_v35, %v2011_v36  ;;  %v2234_v42 = vld [vmem:[#allocation7 + $0x114] sm:$0xf]  ;;  %v1907_v43 = vld [vmem:[#allocation7 + $0x118] sm:$0xf0]  ;;  %v1846_v46 = vor.u32 %v2218_v40, %v1843_v41  ;;  %v2216_v51 = vld [vmem:[#allocation7 + $0x84] sm:$0xf] }
  0x80   : > { %v2258_v44 = vld [vmem:[#allocation9 + $0x54] sm:$0xf]  ;;  %v2003_v45 = vld [vmem:[#allocation9 + $0x58] sm:$0xf0]  ;;  %v1910_v47 = vor.u32 %v2234_v42, %v1907_v43  ;;  %v1835_v53 = vld [vmem:[#allocation7 + $0x88] sm:$0xf0] }
  0x81   : > { %884 = vmatpush.bf16.msrb.mxu0 %v1886_v55  ;;  %v2006_v50 = vor.u32 %v2258_v44, %v2003_v45  ;;  %v1838_v54 = vor.u32 %v2216_v51, %v1835_v53  ;;  %v2232_v55 = vld [vmem:[#allocation7 + $0x104] sm:$0xf]  ;;  %v1899_v56 = vld [vmem:[#allocation7 + $0x108] sm:$0xf0]  ;;  %v1993_v57 = vld [vmem:[#allocation9 + $0x40] sm:$0xf] }
  0x82   : > { %898 = vmatpush.bf16.msrb.mxu1 %v1950_v60  ;;  %v1902_v58 = vor.u32 %v2232_v55, %v1899_v56  ;;  %v2256_v59 = vld [vmem:[#allocation9 + $0x44] sm:$0xf]  ;;  %v1995_v60 = vld [vmem:[#allocation9 + $0x48] sm:$0xf0]  ;;  %v1985_v63 = vld [vmem:[#allocation9 + $0x30] sm:$0xf] }
  0x83   : > { %998 = vmatpush.bf16.msrb.mxu2 %v2010_v3  ;;  %875 = vmatpush.bf16.msra.mxu3 %v1782_v17  ;;  %v1998_v62 = vor.u32 %v2256_v59, %v1995_v60  ;;  %v2255_v0 = vld [vmem:[#allocation9 + $0x34] sm:$0xf0]  ;;  %v2254_v1 = vld [vmem:[#allocation9 + $0x34] sm:$0xf]  ;;  %v1987_v3 = vld [vmem:[#allocation9 + $0x38] sm:$0xf0] }
  0x84   : > { %v1986_v2 = vor.u32 %v2255_v0, %v1985_v63  ;;  %v2253_v5 = vld [vmem:[#allocation9 + $0x24] sm:$0xf0]  ;;  %v2252_v6 = vld [vmem:[#allocation9 + $0x24] sm:$0xf]  ;;  %v1979_v8 = vld [vmem:[#allocation9 + $0x28] sm:$0xf0] }
  0x85   : > { %885 = vmatpush.bf16.msrb.mxu0 %v1878_v4  ;;  %v1977_v4 = vld [vmem:[#allocation9 + $0x20] sm:$0xf]  ;;  %v1969_v10 = vld [vmem:[#allocation9 + $0x10] sm:$0xf]  ;;  %v2251_v11 = vld [vmem:[#allocation9 + $0x14] sm:$0xf0] }
  0x86   : > { %899 = vmatpush.bf16.msrb.mxu1 %v1942_v9  ;;  %v1978_v7 = vor.u32 %v2253_v5, %v1977_v4  ;;  %v1982_v9 = vor.u32 %v2252_v6, %v1979_v8  ;;  %v2250_v12 = vld [vmem:[#allocation9 + $0x14] sm:$0xf]  ;;  %v1970_v13 = vor.u32 %v2251_v11, %v1969_v10  ;;  %v1971_v14 = vld [vmem:[#allocation9 + $0x18] sm:$0xf0]  ;;  %v2248_v17 = vld [vmem:[#allocation9 + $0x4] sm:$0xf] }
  0x87   : > { %999 = vmatpush.bf16.msrb.mxu2 %v2002_v15  ;;  %876 = vmatpush.bf16.msra.mxu3 %v1774_v28  ;;  %v1974_v15 = vor.u32 %v2250_v12, %v1971_v14  ;;  %v1963_v19 = vld [vmem:[#allocation9 + $0x8] sm:$0xf0]  ;;  %v2288_v33 = vld [vmem:[#allocation12 + $0xb8] sm:$0xff]  ;;  %v2287_v35 = vld [vmem:[#allocation12 + $0xb0] sm:$0xff]  ;;  %s2194_s27 = sshll.u32 %s2787_s12, 1  ;;  %s3225_s23 = sld [smem:[#allocation33_spill]] }
  0x88   : > { %v2272_v34 = vld [vmem:[#allocation12 + $0x38] sm:$0xff]  ;;  %v2279_v41 = vld [vmem:[#allocation12 + $0x70] sm:$0xff]  ;;  %v2270_v42 = vld [vmem:[#allocation12 + $0x28] sm:$0xff]  ;;  %s3102_s19 = sadd.s32 %s2321_s4, %s2194_s27  ;;  %s1545_s25 = sshll.u32 %s457_s22, 4  ;;  %s1546_s25 = int_to_ptr.vmem [resolvable:$true] %s1545_s25 }
  0x89   : > { %886 = vmatpush.bf16.msrb.mxu0 %v1870_v16  ;;  %v2249_v16 = vld [vmem:[#allocation9 + $0x4] sm:$0xf0]  ;;  %v2280_v36 = vld [vmem:[#allocation12 + $0x78] sm:$0xff]  ;;  %v2283_v56 = vld [vmem:[#allocation12 + $0x90] sm:$0xff]  ;;  %s2195_s7 = sshll.u32 %s3102_s19, 2  ;;  %s1526_s28 = scalar_lea.sflag [#allocation6], %s3012_s21 }
  0x8a   : > { %900 = vmatpush.bf16.msrb.mxu1 %v1934_v20  ;;  %877 = vmatmul.bf16.vlgmr.msra.gmra.mxu3 %v3054_v48  ;;  %v2257_v48 = vld [vmem:[#allocation9 + $0x44] sm:$0xf0]  ;;  %v1966_v20 = vor.u32 %v2248_v17, %v1963_v19  ;;  %v3074_v40 = vld [vmem:[%s3185_s3] sm:$0x3]  ;;  %v2275_v60 = vld [vmem:[#allocation12 + $0x50] sm:$0xff] }
  0x8b   : > { %1011 = vmatpush.bf16.msrb.mxu3 %v2022_v30  ;;  %v1994_v61 = vor.u32 %v2257_v48, %v1993_v57  ;;  %v2285_v43 = vld [vmem:[#allocation12 + $0xa0] sm:$0xff]  ;;  %v914_v44 = vperm.slane %v3074_v40, 1  ;;  %v2278_v45 = vld [vmem:[#allocation12 + $0x68] sm:$0xff]  ;;  %v2268_v55 = vld [vmem:[#allocation12 + $0x18] sm:$0xff] }
  0x8c   : > { %v2277_v53 = vld [vmem:[#allocation12 + $0x60] sm:$0xff]  ;;  %v2276_v57 = vld [vmem:[#allocation12 + $0x58] sm:$0xff]  ;;  %v2282_v48 = vld [vmem:[#allocation12 + $0x88] sm:$0xff] }
  0x8d   : > { %887 = vmatpush.bf16.msrb.mxu0 %v1862_v27  ;;  %1000 = vmatpush.bf16.msrb.mxu2 %v1994_v61  ;;  %v2281_v63 = vld [vmem:[#allocation12 + $0x80] sm:$0xff]  ;;  %v2184_v14 = vld [vmem:[#allocation13 + $0x70] sm:$0xf]  ;;  %v2303_v19 = vld [vmem:[#allocation13 + $0x74] sm:$0xf]  ;;  %s1544_s29 = scalar_lea.hbm %s3225_s23, %s2195_s7  ;;  %s2681_s18 = scalar_lea.hbm %s3225_s23, 48 }
  0x8e   : > { %901 = vmatpush.bf16.msrb.mxu1 %v1926_v29  ;;  %v2273_v5 = vld [vmem:[#allocation12 + $0x40] sm:$0xff]  ;;  %s1547_s17 = sshll.u32 %s1544_s29, 4  ;;  %s1548_s17 = int_to_ptr.hbm [resolvable:$true] %s1547_s17 }
  0x8f   : > { %1012 = vmatpush.bf16.msrb.mxu3 %v2014_v39  ;;  %v2286_v39 = vld [vmem:[#allocation12 + $0xa8] sm:$0xff]  ;;  %s2675_s5 = sshra.s32 %s1548_s17, 4  ;;  %s2676_s5 = int_to_ptr.hbm [resolvable:$true] %s2675_s5 }
  0x90   : > { %s2677_s13 = scalar_lea.hbm %s2676_s5, 8  ;;  %p2682_p10 = scmp.lt.s32.totalorder %s2676_s5, %s3225_s23 }
  0x91   : > { %888 = vmatpush.bf16.msrb.mxu0 %v1854_v37  ;;  %1001 = vmatpush.bf16.msrb.mxu2 %v1986_v2  ;;  %v2271_v37 = vld [vmem:[#allocation12 + $0x30] sm:$0xff]  ;;  %p2678_p1 = scmp.ne.s32.totalorder %s2676_s5, %s2677_s13  ;;  %p2683_p11 = scmp.lt.s32.totalorder %s2681_s18, %s2677_s13 }
  0x92   : > { %902 = vmatpush.bf16.msrb.mxu1 %v1918_v38 }
  0x93   : > { %1013 = vmatpush.bf16.msrb.mxu3 %v2006_v50  ;;  %v2284_v50 = vld [vmem:[#allocation12 + $0x98] sm:$0xff]  ;;  %p2679_p7 = pnand %p2678_p1, %p2983_p0  ;;  %p2684_p12 = por %p2683_p11, %p2682_p10 }
  0x95   : > { %889 = vmatpush.bf16.msrb.mxu0 %v1846_v46  ;;  %1002 = vmatpush.bf16.msrb.mxu2 %v1978_v7  ;;  %v2269_v46 = vld [vmem:[#allocation12 + $0x20] sm:$0xff]  ;;  %p2680_p8 = pneg %p2679_p7 }
  0x96   : > { %903 = vmatpush.bf16.msrb.mxu1 %v1910_v47 }
  0x97   : > { %1014 = vmatpush.bf16.msrb.mxu3 %v1998_v62  ;;  %v2266_v62 = vld [vmem:[#allocation12 + $0x8] sm:$0xff]  ;;  %p2685_p13 = pnand %p2684_p12, %p2680_p8 }
  0x99   : > { %890 = vmatpush.bf16.msrb.mxu0 %v1838_v54  ;;  %1003 = vmatpush.bf16.msrb.mxu2 %v1970_v13 }
  0x9a   : > { %904 = vmatpush.bf16.msrb.mxu1 %v1902_v58  ;;  %v2267_v58 = vld [vmem:[#allocation12 + $0x10] sm:$0xff] }
  0x9c   : > { %891 = vmatmul.bf16.vlgmr.msrb.gmra.mxu0 %v3059_v52  ;;  %v1990_v52 = vor.u32 %v2254_v1, %v1987_v3  ;;  %v2274_v3 = vld [vmem:[#allocation12 + $0x48] sm:$0xff] }
  0x9d   : > { %905 = vmatmul.bf16.vlgmr.msrb.gmra.mxu1 %v3056_v49  ;;  %v1961_v49 = vld [vmem:[#allocation9] sm:$0xf]  ;;  %1321 = vmatpush.bf16.msra.mxu0 %v2272_v34  ;;  %v2300_v34 = vld [vmem:[#allocation13 + $0x54] sm:$0xf0] }
  0x9e   : > { %1015 = vmatpush.bf16.msrb.mxu3 %v1990_v52  ;;  %v1962_v18 = vor.u32 %v2249_v16, %v1961_v49  ;;  %1335 = vmatpush.bf16.msra.mxu1 %v2280_v36  ;;  %v2265_v52 = vld [vmem:[#allocation12] sm:$0xff]  ;;  %v913_v49 = vperm.slane %v3074_v40, 0 }
  0xa0   : > { %1004 = vmatpush.bf16.msrb.mxu2 %v1962_v18 }
  0xa1   : > { %1322 = vmatpush.bf16.msra.mxu0 %v2271_v37  ;;  %v2299_v37 = vld [vmem:[#allocation13 + $0x54] sm:$0xf] }
  0xa2   : > { %1016 = vmatpush.bf16.msrb.mxu3 %v1982_v9  ;;  %1336 = vmatpush.bf16.msra.mxu1 %v2279_v41 }
  0xa4   : > { %1349 = vmatpush.bf16.msra.mxu2 %v2288_v33  ;;  %v2168_v33 = vld [vmem:[#allocation13 + $0x50] sm:$0xf] }
  0xa5   : > { %1323 = vmatpush.bf16.msra.mxu0 %v2270_v42 }
  0xa6   : > { %1017 = vmatpush.bf16.msrb.mxu3 %v1974_v15  ;;  %1337 = vmatpush.bf16.msra.mxu1 %v2278_v45  ;;  %v2304_v15 = vld [vmem:[#allocation13 + $0x74] sm:$0xf0] }
  0xa7   : > { %v2185_v18 = vor.u32 %v2304_v15, %v2184_v14 }
  0xa8   : > { %1350 = vmatpush.bf16.msra.mxu2 %v2287_v35 }
  0xa9   : > { %1324 = vmatpush.bf16.msra.mxu0 %v2269_v46  ;;  %v2169_v46 = vor.u32 %v2300_v34, %v2168_v33  ;;  %v2146_v34 = vld [vmem:[#allocation13 + $0x28] sm:$0xf0] }
  0xaa   : > { %1018 = vmatpush.bf16.msrb.mxu3 %v1966_v20  ;;  %1338 = vmatpush.bf16.msra.mxu1 %v2277_v53  ;;  %v2186_v20 = vld [vmem:[#allocation13 + $0x78] sm:$0xf0] }
  0xac   : > { %1351 = vmatpush.bf16.msra.mxu2 %v2286_v39  ;;  %v2170_v39 = vld [vmem:[#allocation13 + $0x58] sm:$0xf0] }
  0xad   : > { %1325 = vmatpush.bf16.msra.mxu0 %v2268_v55  ;;  %v2160_v55 = vld [vmem:[#allocation13 + $0x40] sm:$0xf] }
  0xae   : > { %1339 = vmatpush.bf16.msra.mxu1 %v2276_v57  ;;  %1449 = vmatpush.bf16.msra.mxu3 %v2185_v18 }
  0xb0   : > { %1352 = vmatpush.bf16.msra.mxu2 %v2285_v43 }
  0xb1   : > { %1326 = vmatpush.bf16.msra.mxu0 %v2267_v58  ;;  %v2297_v58 = vld [vmem:[#allocation13 + $0x44] sm:$0xf] }
  0xb2   : > { %1340 = vmatpush.bf16.msra.mxu1 %v2275_v60 }
  0xb4   : > { %1353 = vmatpush.bf16.msra.mxu2 %v2284_v50 }
  0xb5   : > { %1327 = vmatpush.bf16.msra.mxu0 %v2266_v62 }
  0xb6   : > { %1341 = vmatpush.bf16.msra.mxu1 %v2274_v3 }
  0xb8   : > { %1354 = vmatpush.bf16.msra.mxu2 %v2283_v56  ;;  %v2298_v56 = vld [vmem:[#allocation13 + $0x44] sm:$0xf0] }
  0xb9   : > { %1328 = vmatpush.bf16.msra.mxu0 %v2265_v52 }
  0xba   : > { %1342 = vmatpush.bf16.msra.mxu1 %v2273_v5 }
  0xbc   : > { %1355 = vmatpush.bf16.msra.mxu2 %v2282_v48  ;;  %v2162_v48 = vld [vmem:[#allocation13 + $0x48] sm:$0xf0] }
  0xc0   : > { %1356 = vmatpush.bf16.msra.mxu2 %v2281_v63  ;;  %v2161_v63 = vor.u32 %v2298_v56, %v2160_v55 }
  0xf9   : > { %v836_v21 = vpop.f32.mrf.mxu0 }
  0xfa   : > { %v850_v22 = vpop.f32.mrf.mxu1 }
  0xfb   : > { %v851_v26 = vadd.f32 %v850_v22, %v836_v21  ;;  %v2189_v22 = vor.u32 %v2303_v19, %v2186_v20 }
  0xfd   : > { %1463 = vmatpush.bf16.msrb.mxu0 %v2189_v22 }
 0x101   : > { %v864_v23 = vpop.f32.mrf.mxu2  ;;  %v838_v24 = vpop.f32.mrf.mxu0 }
 0x102   : > { %v852_v25 = vpop.f32.mrf.mxu1  ;;  %v865_v29 = vadd.f32 %v864_v23, %v851_v26  ;;  %v2176_v23 = vld [vmem:[#allocation13 + $0x60] sm:$0xf] }
 0x103   : > { %v853_v27 = vadd.f32 %v852_v25, %v838_v24  ;;  %v2302_v24 = vld [vmem:[#allocation13 + $0x64] sm:$0xf0]  ;;  %v2301_v25 = vld [vmem:[#allocation13 + $0x64] sm:$0xf] }
 0x104   : > { %v2177_v26 = vor.u32 %v2302_v24, %v2176_v23  ;;  %v2152_v24 = vld [vmem:[#allocation13 + $0x30] sm:$0xf] }
 0x106   : > { %1450 = vmatpush.bf16.msra.mxu3 %v2177_v26  ;;  %v2295_v26 = vld [vmem:[#allocation13 + $0x34] sm:$0xf] }
 0x109   : > { %v866_v28 = vpop.f32.mrf.mxu2 }
 0x10a   : > { %v867_v30 = vadd.f32 %v866_v28, %v853_v27  ;;  %v2178_v27 = vld [vmem:[#allocation13 + $0x68] sm:$0xf0]  ;;  %1451 = vmatpush.bf16.msra.mxu3 %v2169_v46  ;;  %v2289_v46 = vld [vmem:[#allocation13 + $0x4] sm:$0xf] }
 0x10c   : > { %v911_v31 = vpack.c.bf16 %v867_v30, %v865_v29  ;;  %v2464_v29 = vld [vmem:[#allocation10] ss:$0 sm:$0xff] }
 0x10d   : > { %v3067_v32 = vpop.f32.mrf.mxu3 }
 0x10e   : > { %1005 = vmatmul.bf16.vlgmr.msrb.gmra.mxu2 %v911_v31  ;;  %1019 = vmatmul.bf16.vlgmr.msrb.gmra.mxu3 %v911_v31 }
 0x10f   : > { %1452 = vmatpush.bf16.msra.mxu3 %v2161_v63 }
 0x115   : > { %v3069_v38 = vpop.f32.mrf.mxu3 }
 0x119   : > { %v892_v4 = vpop.f32.mrf.mxu0 }
 0x11a   : > { %v906_v9 = vpop.f32.mrf.mxu1  ;;  %v893_v12 = vadd.f32 %v892_v4, %v3067_v32  ;;  %v2181_v32 = vor.u32 %v2301_v25, %v2178_v27  ;;  %v2296_v25 = vld [vmem:[#allocation13 + $0x34] sm:$0xf0] }
 0x11b   : > { %v2153_v27 = vor.u32 %v2296_v25, %v2152_v24 }
 0x11c   : > { %v907_v28 = vadd.f32 %v906_v9, %v893_v12  ;;  %1464 = vmatpush.bf16.msrb.mxu0 %v2181_v32  ;;  %v2293_v32 = vld [vmem:[#allocation13 + $0x24] sm:$0xf] }
 0x11d   : > { %1453 = vmatpush.bf16.msra.mxu3 %v2153_v27 }
 0x121   : > { %v894_v30 = vpop.f32.mrf.mxu0 }
 0x122   : > { %v908_v50 = vpop.f32.mrf.mxu1 }
 0x191   : > { %v1020_v47 = vpop.f32.mrf.mxu3  ;;  %v1006_v16 = vpop.f32.mrf.mxu2 }
 0x192   : > { %v1021_v51 = vadd.f32 %v1020_v47, %v914_v44  ;;  %v1007_v41 = vadd.f32 %v1006_v16, %v913_v49  ;;  %v1069_v47 = vadd.f32 %v2464_v29, %v907_v28  ;;  %v2154_v28 = vld [vmem:[#allocation13 + $0x38] sm:$0xf0] }
 0x194   : > { %v2023_v54 = vmul.f32 -1.442695, %v1021_v51 }
 0x196   : > { %2465 = vpow2.f32 %v2023_v54  ;;  %v2173_v54 = vor.u32 %v2299_v37, %v2170_v39  ;;  %v2292_v37 = vld [vmem:[#allocation13 + $0x14] sm:$0xf0]  ;;  %v2291_v39 = vld [vmem:[#allocation13 + $0x14] sm:$0xf] }
 0x198   : > { %1465 = vmatpush.bf16.msrb.mxu0 %v2173_v54 }
 0x199   : > { %v1022_v59 = vpop.f32.mrf.mxu3  ;;  %v1008_v62 = vpop.f32.mrf.mxu2 }
 0x19a   : > { %v1023_v61 = vadd.f32 %v1022_v59, %v914_v44  ;;  %v895_v44 = vadd.f32 %v894_v30, %v3069_v38  ;;  %v1009_v52 = vadd.f32 %v1008_v62, %v913_v49  ;;  %v2144_v30 = vld [vmem:[#allocation13 + $0x20] sm:$0xf] }
 0x19c   : > { %v2466_v0 = vpop.eup %2465  ;;  %v2024_v1 = vmul.f32 -1.442695, %v1023_v61  ;;  %v909_v61 = vadd.f32 %v908_v50, %v895_v44  ;;  %v2128_v44 = vld [vmem:[#allocation13] sm:$0xf]  ;;  %v2130_v50 = vld [vmem:[#allocation13 + $0x8] sm:$0xf0] }
 0x19d   : > { %v1031_v2 = vadd.f32 1.0, %v2466_v0 }
 0x19e   : > { %2467 = vpow2.f32 %v2024_v1 }
 0x19f   : > { %2469 = vrcp.f32 %v1031_v2  ;;  %v1042_v11 = vand.u32 2147483647, %v1031_v2  ;;  %v1044_v17 = vand.u32 2147483648, %v1031_v2  ;;  %vm1038_vm3 = vweird.f32 %v1031_v2 }
 0x1a1   : > { %v1045_v36 = vor.u32 1.1754944e-38, %v1044_v17  ;;  %vm1043_vm5 = vcmp.eq.f32.partialorder %v1042_v11, 8.507059e+37 }
 0x1a4   : > { %v2468_v6 = vpop.eup %2467 }
 0x1a5   : > { %v2470_v7 = vpop.eup %2469  ;;  %v3077_v8 = vadd.f32 1.0, %v2468_v6 }
 0x1a6   : > { %v1034_v10 = vmul.f32 %v2470_v7, %v1031_v2  ;;  %vm1039_vm2 = vweird.f32 %v2470_v7  ;;  %v2165_v2 = vor.u32 %v2297_v58, %v2162_v48 }
 0x1a7   : > { %2471 = vrcp.f32 %v3077_v8  ;;  %vm1040_vm4 = vmor %vm1038_vm3, %vm1039_vm2  ;;  %v1059_v57 = vand.u32 2147483648, %v3077_v8  ;;  %v1057_v60 = vand.u32 2147483647, %v3077_v8  ;;  %vm1053_vm7 = vweird.f32 %v3077_v8 }
 0x1a8   : > { %v1035_v13 = vsub.f32 1.0, %v1034_v10  ;;  %1466 = vmatpush.bf16.msrb.mxu0 %v2165_v2 }
 0x1a9   : > { %v1060_v3 = vor.u32 1.1754944e-38, %v1059_v57  ;;  %vm1058_vm9 = vcmp.eq.f32.partialorder %v1057_v60, 8.507059e+37 }
 0x1aa   : > { %v1036_v21 = vmul.f32 %v2470_v7, %v1035_v13 }
 0x1ac   : > { %v1037_v31 = vadd.f32 %v2470_v7, %v1036_v21 }
 0x1ad   : > { %v2472_v35 = vpop.eup %2471 }
 0x1ae   : > { %v1049_v42 = vmul.f32 %v2472_v35, %v3077_v8  ;;  %v1041_v43 = vsel %vm1040_vm4, %v2470_v7, %v1037_v31  ;;  %vm1054_vm6 = vweird.f32 %v2472_v35  ;;  %v1070_v7 = vadd.f32 %v2464_v29, %v909_v61  ;;  %v2294_v31 = vld [vmem:[#allocation13 + $0x24] sm:$0xf0] }
 0x1af   : > { %v1046_v45 = vsel %vm1043_vm5, %v1045_v36, %v1041_v43  ;;  %vm1055_vm8 = vmor %vm1053_vm7, %vm1054_vm6  ;;  %v2157_v29 = vor.u32 %v2295_v26, %v2154_v28  ;;  %v2145_v33 = vor.u32 %v2294_v31, %v2144_v30  ;;  %v2136_v36 = vld [vmem:[#allocation13 + $0x10] sm:$0xf] }
 0x1b0   : > { %v1050_v51 = vsub.f32 1.0, %v1049_v42  ;;  %v1063_v53 = vmul.f32 %v1046_v45, %v1007_v41  ;;  %v2137_v41 = vor.u32 %v2292_v37, %v2136_v36  ;;  %v2138_v42 = vld [vmem:[#allocation13 + $0x18] sm:$0xf0]  ;;  %v2290_v45 = vld [vmem:[#allocation13 + $0x4] sm:$0xf0] }
 0x1b1   : > { %1467 = vmatpush.bf16.msrb.mxu0 %v2157_v29  ;;  %1454 = vmatpush.bf16.msra.mxu3 %v2145_v33  ;;  %v2141_v43 = vor.u32 %v2291_v39, %v2138_v42 }
 0x1b2   : > { %v1051_v59 = vmul.f32 %v2472_v35, %v1050_v51  ;;  %v1071_v38 = vadd.f32 %v1069_v47, %v1063_v53  ;;  %v2129_v47 = vor.u32 %v2290_v45, %v2128_v44  ;;  %v2133_v51 = vor.u32 %v2289_v46, %v2130_v50 }
 0x1b4   : > { %v1052_v0 = vadd.f32 %v2472_v35, %v1051_v59  ;;  %v3090_v1 = vpack.c.bf16 %v1071_v38, %v1071_v38 }
 0x1b5   : > { %1455 = vmatpush.bf16.msra.mxu3 %v2137_v41 }
 0x1b6   : > { %v1056_v4 = vsel %vm1055_vm8, %v2472_v35, %v1052_v0  ;;  %v1151_v5 = vunpack.c.l.b16 %v3090_v1  ;;  %v2149_v35 = vor.u32 %v2293_v32, %v2146_v34 }
 0x1b7   : > { %v1061_v6 = vsel %vm1058_vm9, %v1060_v3, %v1056_v4 }
 0x1b8   : > { %v1064_v9 = vmul.f32 %v1061_v6, %v1009_v52  ;;  %v1154_v10 = vpack.c.b16 %v1151_v5, %v1151_v5  ;;  %1468 = vmatpush.bf16.msrb.mxu0 %v2149_v35 }
 0x1b9   : > { %1456 = vmatpush.bf16.msra.mxu3 %v2129_v47 }
 0x1ba   : > { %v1072_v8 = vadd.f32 %v1070_v7, %v1064_v9  ;;  %1158 = vst [vmem:[#allocation3] sm:$0xf] %v1154_v10 }
 0x1bc   : > { %v3095_v11 = vpack.c.bf16 %v1072_v8, %v1072_v8  ;;  %v2313_v13 = vpack.c.bf16 %v1072_v8, %v1071_v38  ;;  %1469 = vmatpush.bf16.msrb.mxu0 %v2141_v43 }
 0x1be   : > { %v1152_v40 = vunpack.c.l.b16 %v3095_v11  ;;  %2314 = vst [vmem:[%s457_s22] sm:$0xff] %v2313_v13  }
 0x1c0   : > { %v1153_v14 = vpack.c.b16 %v1152_v40, %v1151_v5  ;;  %v1155_v15 = vpack.c.b16 %v1152_v40, %v1152_v40  ;;  %1470 = vmatpush.bf16.msrb.mxu0 %v2133_v51 }
 0x1c1   : > { %v2305_v12 = vld [vmem:[#allocation3] sm:$0xff] }
 0x1c2   : > { %v1161_v49 = vrot.slane %v2305_v12, 1  ;;  %v1166_v16 = vrot.slane %v2305_v12, 6  ;;  %1357 = vmatmul.bf16.vlgmr.msra.gmra.mxu2 %v1153_v14  ;;  %1159 = vst [vmem:[#allocation3 + $0x4] sm:$0xf] %v1155_v15  ;;  %v1167_v17 = vrot.slane %v1153_v14, 6  ;;  %v1162_v18 = vrot.slane %v1153_v14, 1 }
 0x1c4   : > { %v1168_v19 = vsel %vm1165_vm10, %v1166_v16, %v1167_v17  ;;  %v1163_v20 = vsel %vm1160_vm11, %v1161_v49, %v1162_v18  ;;  %v1170_v21 = vrot.slane %v1162_v18, 6 }
 0x1c5   : > { %1329 = vmatmul.bf16.vlgmr.msra.gmra.mxu0 %v1168_v19  ;;  %v1169_v22 = vrot.slane %v1163_v20, 6 }
 0x1c7   : > { %v1171_v23 = vsel %vm1165_vm10, %v1169_v22, %v1170_v21 }
 0x1c8   : > { %1343 = vmatmul.bf16.vlgmr.msra.gmra.mxu1 %v1171_v23 }
 0x242   : > { %v1330_v53 = vpop.f32.mrf.mxu0 }
 0x245   : > { %v1344_v54 = vpop.f32.mrf.mxu1  ;;  %v1358_v55 = vpop.f32.mrf.mxu2 }
 0x246   : > { %v1345_v56 = vadd.f32 %v1344_v54, %v1330_v53 }
 0x248   : > { %v1359_v60 = vadd.f32 %v1358_v55, %v1345_v56 }
 0x24a   : > { %v1332_v57 = vpop.f32.mrf.mxu0 }
 0x24d   : > { %v1346_v58 = vpop.f32.mrf.mxu1  ;;  %v1360_v59 = vpop.f32.mrf.mxu2 }
 0x24e   : > { %v1347_v48 = vadd.f32 %v1346_v58, %v1332_v57 }
 0x250   : > { %v1361_v38 = vadd.f32 %v1360_v59, %v1347_v48 }
 0x252   : > { %v1363_v61 = vpack.c.bf16 %v1361_v38, %v1359_v60 }
 0x254   : > { %1457 = vmatmul.bf16.vlgmr.msra.gmra.mxu3 %v1363_v61  ;;  %1471 = vmatmul.bf16.vlgmr.msrb.gmra.mxu0 %v1363_v61 }
 0x255   : > { %2688 = shalt.err (!%p2685_p13)
}
 0x256   : > { %s2815_s22 = smov 64   ;;  %s2816_s27 = smov 4   ;;  %v1517_v35 = vunpack.c.l.bf16 %v3090_v1  ;;  %v1518_v37 = vunpack.c.l.bf16 %v3095_v11 }
 0x257   : > { %2345 = dma.vmem_to_hbm [thread:$0]  (%p2983_p0), %s1546_s25, 128, %s1548_s17, %s1526_s28, %s2815_s22, %s2815_s22, %s2816_s27  }
 0x258   : > { %s3226_s29 = sld [smem:[#allocation32_spill]]  ;;  %s1564_s13 = sshll.u32 %s464_s24, 4  ;;  %s1565_s13 = int_to_ptr.vmem [resolvable:$true] %s1564_s13 }
 0x259   : > { %s3227_s28 = sld [smem:[#allocation34_spill]]  ;;  %s1531_s19 = scalar_lea.sflag [#allocation17], %s3012_s21 }
 0x25e   : > { %v1141_v62 = vld [vmem:[%s3226_s29] sm:$0x3] }
 0x25f   : > { %v1366_v63 = vperm.slane %v1141_v62, 1  ;;  %v1365_v19 = vperm.slane %v1141_v62, 0  ;;  %s1563_s5 = scalar_lea.hbm %s3227_s28, %s2195_s7  ;;  %s2709_s4 = scalar_lea.hbm %s3227_s28, 48 }
 0x260   : > { %s1566_s12 = sshll.u32 %s1563_s5, 4  ;;  %s1567_s12 = int_to_ptr.hbm [resolvable:$true] %s1566_s12 }
 0x261   : > { %s2703_s6 = sshra.s32 %s1567_s12, 4  ;;  %s2704_s6 = int_to_ptr.hbm [resolvable:$true] %s2703_s6 }
 0x262   : > { %s2705_s7 = scalar_lea.hbm %s2704_s6, 8  ;;  %p2710_p9 = scmp.lt.s32.totalorder %s2704_s6, %s3227_s28 }
 0x263   : > { %p2706_p4 = scmp.ne.s32.totalorder %s2704_s6, %s2705_s7  ;;  %p2711_p3 = scmp.lt.s32.totalorder %s2709_s4, %s2705_s7 }
 0x265   : > { %p2707_p5 = pnand %p2706_p4, %p2983_p0  ;;  %p2712_p1 = por %p2711_p3, %p2710_p9 }
 0x267   : > { %p2708_p6 = pneg %p2707_p5 }
 0x269   : > { %p2713_p7 = pnand %p2712_p1, %p2708_p6 }
 0x2d1   : > { %v1472_v0 = vpop.f32.mrf.mxu0 }
 0x2d2   : > { %v1473_v2 = vadd.f32 %v1472_v0, %v1366_v63 }
 0x2d4   : > { %v2190_v3 = vmul.f32 -1.442695, %v1473_v2 }
 0x2d6   : > { %2473 = vpow2.f32 %v2190_v3 }
 0x2d7   : > { %v1458_v40 = vpop.f32.mrf.mxu3 }
 0x2d8   : > { %v1459_v28 = vadd.f32 %v1458_v40, %v1365_v19 }
 0x2d9   : > { %v1474_v52 = vpop.f32.mrf.mxu0 }
 0x2da   : > { %v1475_v4 = vadd.f32 %v1474_v52, %v1366_v63 }
 0x2dc   : > { %v2474_v5 = vpop.eup %2473  ;;  %v2191_v6 = vmul.f32 -1.442695, %v1475_v4 }
 0x2dd   : > { %v1483_v7 = vadd.f32 1.0, %v2474_v5 }
 0x2de   : > { %2475 = vpow2.f32 %v2191_v6 }
 0x2df   : > { %2477 = vrcp.f32 %v1483_v7  ;;  %v1496_v16 = vand.u32 2147483648, %v1483_v7  ;;  %vm1490_vm13 = vweird.f32 %v1483_v7  ;;  %v1494_v17 = vand.u32 2147483647, %v1483_v7  ;;  %v1460_v27 = vpop.f32.mrf.mxu3 }
 0x2e0   : > { %v1461_v32 = vadd.f32 %v1460_v27, %v1365_v19 }
 0x2e1   : > { %v1497_v22 = vor.u32 1.1754944e-38, %v1496_v16  ;;  %vm1495_vm15 = vcmp.eq.f32.partialorder %v1494_v17, 8.507059e+37 }
 0x2e4   : > { %v2476_v9 = vpop.eup %2475 }
 0x2e5   : > { %v2478_v10 = vpop.eup %2477  ;;  %v1484_v8 = vadd.f32 1.0, %v2476_v9 }
 0x2e6   : > { %v1486_v12 = vmul.f32 %v2478_v10, %v1483_v7  ;;  %vm1491_vm12 = vweird.f32 %v2478_v10 }
 0x2e7   : > { %2479 = vrcp.f32 %v1484_v8  ;;  %vm1492_vm14 = vmor %vm1490_vm13, %vm1491_vm12  ;;  %v1511_v23 = vand.u32 2147483648, %v1484_v8  ;;  %v1509_v25 = vand.u32 2147483647, %v1484_v8  ;;  %vm1505_vm1 = vweird.f32 %v1484_v8 }
 0x2e8   : > { %v1487_v13 = vsub.f32 1.0, %v1486_v12 }
 0x2e9   : > { %v1512_v30 = vor.u32 1.1754944e-38, %v1511_v23  ;;  %vm1510_vm3 = vcmp.eq.f32.partialorder %v1509_v25, 8.507059e+37 }
 0x2ea   : > { %v1488_v14 = vmul.f32 %v2478_v10, %v1487_v13 }
 0x2ec   : > { %v1489_v15 = vadd.f32 %v2478_v10, %v1488_v14 }
 0x2ed   : > { %v2480_v49 = vpop.eup %2479 }
 0x2ee   : > { %v1501_v18 = vmul.f32 %v2480_v49, %v1484_v8  ;;  %v1493_v20 = vsel %vm1492_vm14, %v2478_v10, %v1489_v15  ;;  %vm1506_vm0 = vweird.f32 %v2480_v49 }
 0x2ef   : > { %v1498_v26 = vsel %vm1495_vm15, %v1497_v22, %v1493_v20  ;;  %vm1507_vm2 = vmor %vm1505_vm1, %vm1506_vm0 }
 0x2f0   : > { %v1502_v21 = vsub.f32 1.0, %v1501_v18  ;;  %v1515_v31 = vmul.f32 %v1498_v26, %v1459_v28 }
 0x2f2   : > { %v1503_v24 = vmul.f32 %v2480_v49, %v1502_v21  ;;  %v1519_v39 = vadd.f32 %v1517_v35, %v1515_v31 }
 0x2f4   : > { %v1504_v29 = vadd.f32 %v2480_v49, %v1503_v24 }
 0x2f6   : > { %v1508_v33 = vsel %vm1507_vm2, %v2480_v49, %v1504_v29 }
 0x2f7   : > { %v1513_v34 = vsel %vm1510_vm3, %v1512_v30, %v1508_v33 }
 0x2f8   : > { %v1516_v36 = vmul.f32 %v1513_v34, %v1461_v32 }
 0x2fa   : > { %v1520_v41 = vadd.f32 %v1518_v37, %v1516_v36 }
 0x2fc   : > { %v2318_v42 = vpack.c.bf16 %v1520_v41, %v1519_v39 }
 0x2fe   : > { %2319 = vst [vmem:[%s464_s24] sm:$0xff] %v2318_v42  }
 0x2ff   : > { %2716 = shalt.err (!%p2713_p7)
}
 0x300   : > { %2346 = dma.vmem_to_hbm [thread:$0]  (%p2983_p0), %s1565_s13, 128, %s1567_s12, %s1531_s19, %s2815_s22, %s2815_s22, %s2816_s27  }
 0x301 PF: > { %p2387_p8 = scmp.ge.s32.totalorder %s2803_s16, 2  ;;  %s1581_s2 = sand.u32 1, %s2775_s30  }
 0x302   : > { %s1582_s24 = scalar_lea.sflag [#allocation6], %s1581_s2 }
 0x303   : > { %p2370_p10 = pnand %p2387_p8, %p2989_p2 }
 0x305   : > { %p2371_p11 = pneg %p2370_p10 }
 0x307   : > { %2766 = dma.done.wait (%p2371_p11), %s1582_s24, 128  }
 0x308   : > { %2768 = vsyncadd (%p2371_p11), %s1582_s24, 4294967168  ;;  %s1592_s29 = scalar_lea.sflag [#allocation17], %s1581_s2 }
 0x309   : > { %2770 = dma.done.wait (%p2371_p11), %s1592_s29, 128  }
 0x30a   : > { %2772 = vsyncadd (%p2371_p11), %s1592_s29, 4294967168  ;;  %s32_s16 = sadd.s32 1, %s2803_s16   ;;  %s3229_s1 = sld [smem:[#allocation24_spill]] }
 0x30b   : > { %p29_p12 = scmp.ge.s32.totalorder %s32_s16, 8   ;;  %s3230_s22 = sld [smem:[#allocation25_spill]] }
 0x30c   : > { %s3231_s30 = smov %s2779_s10  ;;  %s3232_s10 = smov %s2783_s11 }
 0x30d   : > { %s3233_s11 = smov %s2999_s20  ;;  %s3234_s12 = smov %s2795_s14 }
 0x30e   : > { %s3235_s13 = smov %s2799_s15  ;;  %31 = sbr.rel (!%p29_p12) target bundleno = 21 (0x15), region = 138 }
 0x310   : > { %s3236_s14 = smov %s3229_s1 }
 0x311   : > { %s3237_s15 = smov %s3230_s22 }
 0x313   :  { %1598 = vsyncpa [#allocation5], 1 }
 0x314   :  { %1600 = vsyncpa [#allocation5 + $0x1], 1 }
 0x315   :  { %1601 = vsyncpa [#allocation8], 1 }
 0x316   :  { %1602 = vsyncpa [#allocation11], 1 }
 0x317   :  { %1603 = vsyncpa [#allocation14], 1 }
 0x318   :  { %1604 = vsyncpa [#allocation6], 1 }
 0x319   :  { %1606 = vsyncpa [#allocation6 + $0x1], 1 }
 0x31a   :  { %1607 = vsyncpa [#allocation17], 1 }
 0x31b   :  { %1609 = vsyncpa [#allocation17 + $0x1], 1 }

</bundles_post_ra>
